<compile_context>
chip_gen: v7x
topology: tpu7x:2x2x1
jax: 0.10.0
libtpu: 0.0.40
codegen_flags: <defaults>
</compile_context>

<pallas_src>
import functools
import math

import jax
import jax.numpy as jnp
from jax.experimental import pallas as pl
from jax.experimental.pallas import tpu as pltpu


def _layer_norm(x, gamma, beta, eps=1e-5):
    mu = jnp.mean(x, axis=-1, keepdims=True)
    xc = x - mu
    var = jnp.mean(xc * xc, axis=-1, keepdims=True)
    return xc * jax.lax.rsqrt(var + eps) * gamma + beta


def transformer_layer_kernel(*refs, n_heads, d_k, mask_k, zero_pad, apply_pos,
                             kq_same, same_qkv, matmul_dtype):
    """One batch element per grid step; full transformer block fused."""
    i = 0
    if same_qkv:
        xq_ref = xk_ref = xv_ref = refs[i]
        i += 1
    else:
        xq_ref, xk_ref, xv_ref = refs[i:i + 3]
        i += 3
    if kq_same:
        wkT_r, wvT_r, woT_r = refs[i:i + 3]; i += 3
        bk_r, bv_r, bo_r = refs[i:i + 3]; i += 3
        wqT_r, bq_r = wkT_r, bk_r
    else:
        wqT_r, wkT_r, wvT_r, woT_r = refs[i:i + 4]; i += 4
        bq_r, bk_r, bv_r, bo_r = refs[i:i + 4]; i += 4
    (g1_r, be1_r, w1T_r, b1_r, w2T_r, b2_r, g2_r, be2_r, o_ref) = refs[i:i + 9]

    cast = (lambda t: t.astype(matmul_dtype)) if matmul_dtype is not None else (lambda t: t)

    xq = xq_ref[0]                                           # (S, D)
    xk = xq if same_qkv else xk_ref[0]
    xv = xq if same_qkv else xv_ref[0]
    S, D = xq.shape
    H, dk = n_heads, d_k

    # Projections: weights are pre-transposed in the wrapper, so y = x @ Wt + b.
    qp = jnp.dot(cast(xq), cast(wqT_r[...]), preferred_element_type=jnp.float32) + bq_r[...]
    kp = jnp.dot(cast(xk), cast(wkT_r[...]), preferred_element_type=jnp.float32) + bk_r[...]
    vp = jnp.dot(cast(xv), cast(wvT_r[...]), preferred_element_type=jnp.float32) + bv_r[...]

    qh = qp.reshape(S, H, dk)
    kh = kp.reshape(S, H, dk)
    vh = vp.reshape(S, H, dk)

    scale = 1.0 / math.sqrt(dk)
    # Batched over heads in a single contraction (no per-head loop / concat).
    s = jnp.einsum('qhd,khd->hqk', cast(qh), cast(kh),
                   preferred_element_type=jnp.float32) * scale          # (H, S, S)

    # nopeek mask generated in-kernel: allowed where (col - row) < mask_k.
    rows = jax.lax.broadcasted_iota(jnp.int32, (S, S), 0)
    cols = jax.lax.broadcasted_iota(jnp.int32, (S, S), 1)
    add_mask = jnp.where((cols - rows) < mask_k, 0.0, -1e32).astype(jnp.float32)
    s = s + add_mask[None, :, :]

    # Softmax (f32), denominator via approx reciprocal on the EUP.
    m = jnp.max(s, axis=-1, keepdims=True)
    e = jnp.exp(s - m)
    inv = pl.reciprocal(jnp.sum(e, axis=-1, keepdims=True), approx=True)
    p = e * inv                                                          # (H, S, S)

    ctx = jnp.einsum('hqk,khd->qhd', cast(p), cast(vh),
                     preferred_element_type=jnp.float32).reshape(S, D)   # (S, D)

    if zero_pad:
        # torch.cat([zeros(.,.,1,S), scores[:,:,1:,:]]) == zero row 0 of the
        # probabilities, which is equivalent to zeroing row 0 of the context.
        row_id = jax.lax.broadcasted_iota(jnp.int32, (S, D), 0)
        ctx = jnp.where(row_id == 0, 0.0, ctx)

    attn = jnp.dot(cast(ctx), cast(woT_r[...]), preferred_element_type=jnp.float32) + bo_r[...]

    # Residual + LayerNorm1 (dropout1 = identity in eval).
    x = xq.astype(jnp.float32) + attn
    x = _layer_norm(x, g1_r[...], be1_r[...])

    if apply_pos:
        h1 = jnp.dot(cast(x), cast(w1T_r[...]), preferred_element_type=jnp.float32) + b1_r[...]
        h1 = jnp.maximum(h1, 0.0)                                        # ReLU
        ff = jnp.dot(cast(h1), cast(w2T_r[...]), preferred_element_type=jnp.float32) + b2_r[...]
        x = _layer_norm(x + ff, g2_r[...], be2_r[...])

    o_ref[0] = x.astype(o_ref.dtype)


def transformer_layer(mask_k, q, k, v, params, *, n_heads, d_k, kq_same,
                      apply_pos=True, matmul_dtype=None):
    """mask_k: the integer `mask` argument of TransformerLayer.forward (0 or 1)."""
    B, S, D = q.shape
    d_ff = params["w1"].shape[0]
    zero_pad = (mask_k == 0)
    same_qkv = (q is k) and (k is v)

    # Pre-transpose all weights once on the host side (avoid per-step XLU vxpose).
    wkT = params["wk"].T
    wvT = params["wv"].T
    woT = params["wo"].T
    w1T = params["w1"].T            # (D, d_ff)
    w2T = params["w2"].T            # (d_ff, D)

    x_spec = pl.BlockSpec((1, S, D), lambda b: (b, 0, 0))

    def rep(shape):
        return pl.BlockSpec(shape, lambda b, _n=len(shape): (0,) * _n)

    args, specs = [], []
    if same_qkv:
        args += [q]
        specs += [x_spec]
    else:
        args += [q, k, v]
        specs += [x_spec, x_spec, x_spec]

    if kq_same:
        w_list = [wkT, wvT, woT]
        b_list = [params["bk"], params["bv"], params["bo"]]
    else:
        w_list = [params["wq"].T, wkT, wvT, woT]
        b_list = [params["bq"], params["bk"], params["bv"], params["bo"]]
    args += w_list
    specs += [rep((D, D))] * len(w_list)
    args += [b.reshape(1, D) for b in b_list]
    specs += [rep((1, D))] * len(b_list)

    args += [params["g1"].reshape(1, D), params["be1"].reshape(1, D),
             w1T, params["b1"].reshape(1, d_ff),
             w2T, params["b2"].reshape(1, D),
             params["g2"].reshape(1, D), params["be2"].reshape(1, D)]
    specs += [rep((1, D)), rep((1, D)),
              rep((D, d_ff)), rep((1, d_ff)),
              rep((d_ff, D)), rep((1, D)),
              rep((1, D)), rep((1, D))]

    kernel = functools.partial(
        transformer_layer_kernel,
        n_heads=n_heads, d_k=d_k, mask_k=mask_k, zero_pad=zero_pad,
        apply_pos=apply_pos, kq_same=kq_same, same_qkv=same_qkv,
        matmul_dtype=matmul_dtype)

    return pl.pallas_call(
        kernel,
        out_shape=jax.ShapeDtypeStruct((B, S, D), q.dtype),
        grid=(B,),
        in_specs=specs,
        out_specs=x_spec,
        compiler_params=pltpu.CompilerParams(dimension_semantics=("parallel",)),
    )(*args)


# ----------------------------------------------------------------------------
# Pure-JAX reference (eval-mode PyTorch forward) and test harness.
# ----------------------------------------------------------------------------

def _xavier_uniform(key, shape):
    fan_out, fan_in = shape
    bound = math.sqrt(6.0 / (fan_in + fan_out))
    return jax.random.uniform(key, shape, jnp.float32, -bound, bound)


def _reference(mask_k, q, k, v, params, *, n_heads, d_k, kq_same, apply_pos=True):
    B, S, D = q.shape
    H, dk = n_heads, d_k
    wk, bk = params["wk"], params["bk"]
    wv, bv = params["wv"], params["bv"]
    wo, bo = params["wo"], params["bo"]
    wq, bq = (wk, bk) if kq_same else (params["wq"], params["bq"])
    zero_pad = (mask_k == 0)

    def proj(x, w, b):
        return (x @ w.T + b).reshape(B, S, H, dk).transpose(0, 2, 1, 3)

    qh, kh, vh = proj(q, wq, bq), proj(k, wk, bk), proj(v, wv, bv)
    scores = jnp.einsum("bhqd,bhkd->bhqk", qh, kh) / math.sqrt(dk)
    rows = jnp.arange(S)[:, None]
    cols = jnp.arange(S)[None, :]
    allowed = (cols - rows) < mask_k          # src_mask != 0
    scores = jnp.where(allowed[None, None], scores, -1e32)
    p = jax.nn.softmax(scores, axis=-1)
    if zero_pad:
        p = p.at[:, :, 0, :].set(0.0)
    ctx = jnp.einsum("bhqk,bhkd->bhqd", p, vh)
    concat = ctx.transpose(0, 2, 1, 3).reshape(B, S, D)
    attn = concat @ wo.T + bo

    def ln(x, g, b, eps=1e-5):
        mu = x.mean(-1, keepdims=True)
        var = ((x - mu) ** 2).mean(-1, keepdims=True)
        return (x - mu) / jnp.sqrt(var + eps) * g + b

    x = q + attn
    x = ln(x, params["g1"], params["be1"])
    if apply_pos:
        h = jnp.maximum(x @ params["w1"].T + params["b1"], 0.0)
        ff = h @ params["w2"].T + params["b2"]
        x = ln(x + ff, params["g2"], params["be2"])
    return x


if __name__ == "__main__":
    B, S, D, H, d_ff = 2, 8, 32, 4, 64
    dk = D // H

    key = jax.random.PRNGKey(0)
    ks = jax.random.split(key, 16)

    q = jax.random.normal(ks[0], (B, S, D), jnp.float32)
    k = jax.random.normal(ks[1], (B, S, D), jnp.float32)
    v = jax.random.normal(ks[2], (B, S, D), jnp.float32)

    def small(kk, shape):
        return 0.1 * jax.random.normal(kk, shape, jnp.float32)

    params = {
        "wq": _xavier_uniform(ks[3], (D, D)), "bq": small(ks[4], (D,)),
        "wk": _xavier_uniform(ks[5], (D, D)), "bk": small(ks[6], (D,)),
        "wv": _xavier_uniform(ks[7], (D, D)), "bv": small(ks[8], (D,)),
        "wo": _xavier_uniform(ks[9], (D, D)), "bo": small(ks[10], (D,)),
        "g1": 1.0 + small(ks[11], (D,)), "be1": small(ks[12], (D,)),
        "w1": _xavier_uniform(ks[13], (d_ff, D)), "b1": small(ks[14], (d_ff,)),
        "w2": _xavier_uniform(ks[15], (D, d_ff)), "b2": jnp.zeros((D,), jnp.float32),
        "g2": jnp.ones((D,), jnp.float32), "be2": jnp.zeros((D,), jnp.float32),
    }

    # Case 1: mask=0 (zero_pad=True), kq_same=False, distinct q/k/v.
    out1 = transformer_layer(0, q, k, v, params, n_heads=H, d_k=dk,
                             kq_same=False, apply_pos=True)
    out1 = jax.block_until_ready(out1)
    ref1 = _reference(0, q, k, v, params, n_heads=H, d_k=dk, kq_same=False)
    assert out1.shape == (B, S, D)
    assert jnp.allclose(out1, ref1, atol=2e-2, rtol=2e-2), "case 1 mismatch vs reference"

    # Case 2: mask=1 (zero_pad=False), kq_same=True, self-attention (q is k is v):
    # exercises the shared-weight and shared-input fast paths.
    params2 = {kk: vv for kk, vv in params.items() if kk not in ("wq", "bq")}
    out2 = transformer_layer(1, q, q, q, params2, n_heads=H, d_k=dk,
                             kq_same=True, apply_pos=True)
    out2 = jax.block_until_ready(out2)
    ref2 = _reference(1, q, q, q, params2, n_heads=H, d_k=dk, kq_same=True)
    assert jnp.allclose(out2, ref2, atol=2e-2, rtol=2e-2), "case 2 mismatch vs reference"

    print("KERNEL_OK")
</pallas_src>

<mosaic_0001>
module attributes {stable_mosaic.version = 11 : i64} {
  func.func @transformer_layer_kernel(%arg0: i32, %arg1: memref<1x8x32xf32, #tpu.memory_space<vmem>>, %arg2: memref<1x8x32xf32, #tpu.memory_space<vmem>>, %arg3: memref<1x8x32xf32, #tpu.memory_space<vmem>>, %arg4: memref<32x32xf32, #tpu.memory_space<vmem>>, %arg5: memref<32x32xf32, #tpu.memory_space<vmem>>, %arg6: memref<32x32xf32, #tpu.memory_space<vmem>>, %arg7: memref<32x32xf32, #tpu.memory_space<vmem>>, %arg8: memref<1x32xf32, #tpu.memory_space<vmem>>, %arg9: memref<1x32xf32, #tpu.memory_space<vmem>>, %arg10: memref<1x32xf32, #tpu.memory_space<vmem>>, %arg11: memref<1x32xf32, #tpu.memory_space<vmem>>, %arg12: memref<1x32xf32, #tpu.memory_space<vmem>>, %arg13: memref<1x32xf32, #tpu.memory_space<vmem>>, %arg14: memref<32x64xf32, #tpu.memory_space<vmem>>, %arg15: memref<1x64xf32, #tpu.memory_space<vmem>>, %arg16: memref<64x32xf32, #tpu.memory_space<vmem>>, %arg17: memref<1x32xf32, #tpu.memory_space<vmem>>, %arg18: memref<1x32xf32, #tpu.memory_space<vmem>>, %arg19: memref<1x32xf32, #tpu.memory_space<vmem>>, %arg20: memref<1x8x32xf32, #tpu.memory_space<vmem>>) attributes {dimension_semantics = [#tpu.dimension_semantics<parallel>], iteration_bounds = array<i64: 2>, scalar_prefetch = 0 : i64, scratch_operands = 0 : i64, tpu.core_type = #tpu.core_type<tc>, window_params = [{transform_indices = @transform_0, window_bounds = array<i64: 1, 8, 32>}, {transform_indices = @transform_1, window_bounds = array<i64: 1, 8, 32>}, {transform_indices = @transform_2, window_bounds = array<i64: 1, 8, 32>}, {pipeline_mode = #tpu.pipeline_mode<synchronous>, transform_indices = @transform_3, window_bounds = array<i64: 32, 32>}, {pipeline_mode = #tpu.pipeline_mode<synchronous>, transform_indices = @transform_4, window_bounds = array<i64: 32, 32>}, {pipeline_mode = #tpu.pipeline_mode<synchronous>, transform_indices = @transform_5, window_bounds = array<i64: 32, 32>}, {pipeline_mode = #tpu.pipeline_mode<synchronous>, transform_indices = @transform_6, window_bounds = array<i64: 32, 32>}, {pipeline_mode = #tpu.pipeline_mode<synchronous>, transform_indices = @transform_7, window_bounds = array<i64: 1, 32>}, {pipeline_mode = #tpu.pipeline_mode<synchronous>, transform_indices = @transform_8, window_bounds = array<i64: 1, 32>}, {pipeline_mode = #tpu.pipeline_mode<synchronous>, transform_indices = @transform_9, window_bounds = array<i64: 1, 32>}, {pipeline_mode = #tpu.pipeline_mode<synchronous>, transform_indices = @transform_10, window_bounds = array<i64: 1, 32>}, {pipeline_mode = #tpu.pipeline_mode<synchronous>, transform_indices = @transform_11, window_bounds = array<i64: 1, 32>}, {pipeline_mode = #tpu.pipeline_mode<synchronous>, transform_indices = @transform_12, window_bounds = array<i64: 1, 32>}, {pipeline_mode = #tpu.pipeline_mode<synchronous>, transform_indices = @transform_13, window_bounds = array<i64: 32, 64>}, {pipeline_mode = #tpu.pipeline_mode<synchronous>, transform_indices = @transform_14, window_bounds = array<i64: 1, 64>}, {pipeline_mode = #tpu.pipeline_mode<synchronous>, transform_indices = @transform_15, window_bounds = array<i64: 64, 32>}, {pipeline_mode = #tpu.pipeline_mode<synchronous>, transform_indices = @transform_16, window_bounds = array<i64: 1, 32>}, {pipeline_mode = #tpu.pipeline_mode<synchronous>, transform_indices = @transform_17, window_bounds = array<i64: 1, 32>}, {pipeline_mode = #tpu.pipeline_mode<synchronous>, transform_indices = @transform_18, window_bounds = array<i64: 1, 32>}, {transform_indices = @transform_19, window_bounds = array<i64: 1, 8, 32>}]} {
    %c0 = arith.constant 0 : index
    %c0_0 = arith.constant 0 : index
    %c0_1 = arith.constant 0 : index
    %0 = vector.load %arg1[%c0, %c0_0, %c0_1] : memref<1x8x32xf32, #tpu.memory_space<vmem>>, vector<1x8x32xf32>
    %1 = vector.shape_cast %0 : vector<1x8x32xf32> to vector<8x32xf32>
    %c0_2 = arith.constant 0 : index
    %c0_3 = arith.constant 0 : index
    %c0_4 = arith.constant 0 : index
    %2 = vector.load %arg2[%c0_2, %c0_3, %c0_4] : memref<1x8x32xf32, #tpu.memory_space<vmem>>, vector<1x8x32xf32>
    %3 = vector.shape_cast %2 : vector<1x8x32xf32> to vector<8x32xf32>
    %c0_5 = arith.constant 0 : index
    %c0_6 = arith.constant 0 : index
    %c0_7 = arith.constant 0 : index
    %4 = vector.load %arg3[%c0_5, %c0_6, %c0_7] : memref<1x8x32xf32, #tpu.memory_space<vmem>>, vector<1x8x32xf32>
    %5 = vector.shape_cast %4 : vector<1x8x32xf32> to vector<8x32xf32>
    %c0_8 = arith.constant 0 : index
    %c0_9 = arith.constant 0 : index
    %6 = vector.load %arg4[%c0_8, %c0_9] : memref<32x32xf32, #tpu.memory_space<vmem>>, vector<32x32xf32>
    %cst = arith.constant dense<0.000000e+00> : vector<8x32xf32>
    %7 = tpu.matmul %1, %6, %cst {dimension_numbers = #tpu.dot_dimension_numbers<[1], [0], [0], [1], [0, 0, 1, 1], [], []>} : vector<8x32xf32>, vector<32x32xf32>, vector<8x32xf32> -> vector<8x32xf32>
    %c0_10 = arith.constant 0 : index
    %c0_11 = arith.constant 0 : index
    %8 = vector.load %arg8[%c0_10, %c0_11] : memref<1x32xf32, #tpu.memory_space<vmem>>, vector<1x32xf32>
    %9 = vector.broadcast %8 : vector<1x32xf32> to vector<8x32xf32>
    %10 = arith.addf %7, %9 : vector<8x32xf32>
    %c0_12 = arith.constant 0 : index
    %c0_13 = arith.constant 0 : index
    %11 = vector.load %arg5[%c0_12, %c0_13] : memref<32x32xf32, #tpu.memory_space<vmem>>, vector<32x32xf32>
    %cst_14 = arith.constant dense<0.000000e+00> : vector<8x32xf32>
    %12 = tpu.matmul %3, %11, %cst_14 {dimension_numbers = #tpu.dot_dimension_numbers<[1], [0], [0], [1], [0, 0, 1, 1], [], []>} : vector<8x32xf32>, vector<32x32xf32>, vector<8x32xf32> -> vector<8x32xf32>
    %c0_15 = arith.constant 0 : index
    %c0_16 = arith.constant 0 : index
    %13 = vector.load %arg9[%c0_15, %c0_16] : memref<1x32xf32, #tpu.memory_space<vmem>>, vector<1x32xf32>
    %14 = vector.broadcast %13 : vector<1x32xf32> to vector<8x32xf32>
    %15 = arith.addf %12, %14 : vector<8x32xf32>
    %c0_17 = arith.constant 0 : index
    %c0_18 = arith.constant 0 : index
    %16 = vector.load %arg6[%c0_17, %c0_18] : memref<32x32xf32, #tpu.memory_space<vmem>>, vector<32x32xf32>
    %cst_19 = arith.constant dense<0.000000e+00> : vector<8x32xf32>
    %17 = tpu.matmul %5, %16, %cst_19 {dimension_numbers = #tpu.dot_dimension_numbers<[1], [0], [0], [1], [0, 0, 1, 1], [], []>} : vector<8x32xf32>, vector<32x32xf32>, vector<8x32xf32> -> vector<8x32xf32>
    %c0_20 = arith.constant 0 : index
    %c0_21 = arith.constant 0 : index
    %18 = vector.load %arg10[%c0_20, %c0_21] : memref<1x32xf32, #tpu.memory_space<vmem>>, vector<1x32xf32>
    %19 = vector.broadcast %18 : vector<1x32xf32> to vector<8x32xf32>
    %20 = arith.addf %17, %19 : vector<8x32xf32>
    %21 = vector.shape_cast %10 : vector<8x32xf32> to vector<8x4x8xf32>
    %22 = vector.shape_cast %15 : vector<8x32xf32> to vector<8x4x8xf32>
    %23 = vector.shape_cast %20 : vector<8x32xf32> to vector<8x4x8xf32>
    "tpu.trace_start"() <{level = 10 : i32, message = "qhd,khd->hqk"}> : () -> ()
    %cst_22 = arith.constant dense<0.000000e+00> : vector<4x8x8xf32>
    %24 = tpu.matmul %21, %22, %cst_22 {dimension_numbers = #tpu.dot_dimension_numbers<[2], [2], [0], [0], [0, 1, 0, 0, 1, 0], [1], [1]>} : vector<8x4x8xf32>, vector<8x4x8xf32>, vector<4x8x8xf32> -> vector<4x8x8xf32>
    "tpu.trace_stop"() : () -> ()
    %cst_23 = arith.constant 0.353553385 : f32
    %25 = vector.broadcast %cst_23 : f32 to vector<4x8x8xf32>
    %26 = arith.mulf %24, %25 : vector<4x8x8xf32>
    %27 = tpu.iota {dimensions = array<i32: 0>} : vector<8x8xi32>
    %28 = tpu.iota {dimensions = array<i32: 1>} : vector<8x8xi32>
    %29 = arith.subi %28, %27 : vector<8x8xi32>
    %c0_i32 = arith.constant 0 : i32
    %30 = vector.broadcast %c0_i32 : i32 to vector<8x8xi32>
    %31 = arith.cmpi slt, %29, %30 : vector<8x8xi32>
    %cst_24 = arith.constant 0.000000e+00 : f32
    %cst_25 = arith.constant -1.000000e+32 : f32
    %32 = vector.broadcast %cst_24 : f32 to vector<8x8xf32>
    %33 = vector.broadcast %cst_25 : f32 to vector<8x8xf32>
    %34 = arith.select %31, %32, %33 : vector<8x8xi1>, vector<8x8xf32>
    %35 = vector.shape_cast %34 : vector<8x8xf32> to vector<1x8x8xf32>
    %36 = vector.broadcast %35 : vector<1x8x8xf32> to vector<4x8x8xf32>
    %37 = arith.addf %26, %36 : vector<4x8x8xf32>
    %cst_26 = arith.constant dense<0xFF800000> : vector<4x8xf32>
    %38 = vector.multi_reduction <maximumf>, %37, %cst_26 [2] : vector<4x8x8xf32> to vector<4x8xf32>
    %39 = vector.shape_cast %38 : vector<4x8xf32> to vector<4x8x1xf32>
    %40 = vector.broadcast %39 : vector<4x8x1xf32> to vector<4x8x8xf32>
    %41 = arith.subf %37, %40 : vector<4x8x8xf32>
    %42 = math.exp %41 : vector<4x8x8xf32>
    %cst_27 = arith.constant dense<0.000000e+00> : vector<4x8xf32>
    %43 = vector.multi_reduction <add>, %42, %cst_27 [2] : vector<4x8x8xf32> to vector<4x8xf32>
    %44 = vector.shape_cast %43 : vector<4x8xf32> to vector<4x8x1xf32>
    %45 = tpu.reciprocal %44 {approx = true} : vector<4x8x1xf32> -> vector<4x8x1xf32>
    %46 = vector.broadcast %45 : vector<4x8x1xf32> to vector<4x8x8xf32>
    %47 = arith.mulf %42, %46 : vector<4x8x8xf32>
    "tpu.trace_start"() <{level = 10 : i32, message = "hqk,khd->qhd"}> : () -> ()
    %cst_28 = arith.constant dense<0.000000e+00> : vector<4x8x8xf32>
    %48 = tpu.matmul %23, %47, %cst_28 {dimension_numbers = #tpu.dot_dimension_numbers<[0], [2], [2], [1], [0, 1, 0, 2, 1, 1], [1], [0]>} : vector<8x4x8xf32>, vector<4x8x8xf32>, vector<4x8x8xf32> -> vector<4x8x8xf32>
    %49 = tpu.transpose %48, [2, 0, 1] : vector<4x8x8xf32> -> vector<8x4x8xf32>
    "tpu.trace_stop"() : () -> ()
    %50 = vector.shape_cast %49 : vector<8x4x8xf32> to vector<8x32xf32>
    %51 = tpu.iota {dimensions = array<i32: 0>} : vector<8x32xi32>
    %c0_i32_29 = arith.constant 0 : i32
    %52 = vector.broadcast %c0_i32_29 : i32 to vector<8x32xi32>
    %53 = arith.cmpi eq, %51, %52 : vector<8x32xi32>
    %cst_30 = arith.constant 0.000000e+00 : f32
    %54 = vector.broadcast %cst_30 : f32 to vector<8x32xf32>
    %55 = arith.select %53, %54, %50 : vector<8x32xi1>, vector<8x32xf32>
    %c0_31 = arith.constant 0 : index
    %c0_32 = arith.constant 0 : index
    %56 = vector.load %arg7[%c0_31, %c0_32] : memref<32x32xf32, #tpu.memory_space<vmem>>, vector<32x32xf32>
    %cst_33 = arith.constant dense<0.000000e+00> : vector<8x32xf32>
    %57 = tpu.matmul %55, %56, %cst_33 {dimension_numbers = #tpu.dot_dimension_numbers<[1], [0], [0], [1], [0, 0, 1, 1], [], []>} : vector<8x32xf32>, vector<32x32xf32>, vector<8x32xf32> -> vector<8x32xf32>
    %c0_34 = arith.constant 0 : index
    %c0_35 = arith.constant 0 : index
    %58 = vector.load %arg11[%c0_34, %c0_35] : memref<1x32xf32, #tpu.memory_space<vmem>>, vector<1x32xf32>
    %59 = vector.broadcast %58 : vector<1x32xf32> to vector<8x32xf32>
    %60 = arith.addf %57, %59 : vector<8x32xf32>
    %61 = arith.addf %1, %60 : vector<8x32xf32>
    %c0_36 = arith.constant 0 : index
    %c0_37 = arith.constant 0 : index
    %62 = vector.load %arg12[%c0_36, %c0_37] : memref<1x32xf32, #tpu.memory_space<vmem>>, vector<1x32xf32>
    %c0_38 = arith.constant 0 : index
    %c0_39 = arith.constant 0 : index
    %63 = vector.load %arg13[%c0_38, %c0_39] : memref<1x32xf32, #tpu.memory_space<vmem>>, vector<1x32xf32>
    %cst_40 = arith.constant dense<0.000000e+00> : vector<8xf32>
    %64 = vector.multi_reduction <add>, %61, %cst_40 [1] : vector<8x32xf32> to vector<8xf32>
    %65 = vector.shape_cast %64 : vector<8xf32> to vector<8x1xf32>
    %cst_41 = arith.constant 3.200000e+01 : f32
    %66 = vector.broadcast %cst_41 : f32 to vector<8x1xf32>
    %67 = arith.divf %65, %66 : vector<8x1xf32>
    %68 = vector.broadcast %67 : vector<8x1xf32> to vector<8x32xf32>
    %69 = arith.subf %61, %68 : vector<8x32xf32>
    %70 = arith.mulf %69, %69 : vector<8x32xf32>
    %cst_42 = arith.constant dense<0.000000e+00> : vector<8xf32>
    %71 = vector.multi_reduction <add>, %70, %cst_42 [1] : vector<8x32xf32> to vector<8xf32>
    %72 = vector.shape_cast %71 : vector<8xf32> to vector<8x1xf32>
    %cst_43 = arith.constant 3.200000e+01 : f32
    %73 = vector.broadcast %cst_43 : f32 to vector<8x1xf32>
    %74 = arith.divf %72, %73 : vector<8x1xf32>
    %cst_44 = arith.constant 9.99999974E-6 : f32
    %75 = vector.broadcast %cst_44 : f32 to vector<8x1xf32>
    %76 = arith.addf %74, %75 : vector<8x1xf32>
    %77 = math.rsqrt %76 : vector<8x1xf32>
    %78 = vector.broadcast %77 : vector<8x1xf32> to vector<8x32xf32>
    %79 = arith.mulf %69, %78 : vector<8x32xf32>
    %80 = vector.broadcast %62 : vector<1x32xf32> to vector<8x32xf32>
    %81 = arith.mulf %79, %80 : vector<8x32xf32>
    %82 = vector.broadcast %63 : vector<1x32xf32> to vector<8x32xf32>
    %83 = arith.addf %81, %82 : vector<8x32xf32>
    %c0_45 = arith.constant 0 : index
    %c0_46 = arith.constant 0 : index
    %84 = vector.load %arg14[%c0_45, %c0_46] : memref<32x64xf32, #tpu.memory_space<vmem>>, vector<32x64xf32>
    %cst_47 = arith.constant dense<0.000000e+00> : vector<8x64xf32>
    %85 = tpu.matmul %83, %84, %cst_47 {dimension_numbers = #tpu.dot_dimension_numbers<[1], [0], [0], [1], [0, 0, 1, 1], [], []>} : vector<8x32xf32>, vector<32x64xf32>, vector<8x64xf32> -> vector<8x64xf32>
    %c0_48 = arith.constant 0 : index
    %c0_49 = arith.constant 0 : index
    %86 = vector.load %arg15[%c0_48, %c0_49] : memref<1x64xf32, #tpu.memory_space<vmem>>, vector<1x64xf32>
    %87 = vector.broadcast %86 : vector<1x64xf32> to vector<8x64xf32>
    %88 = arith.addf %85, %87 : vector<8x64xf32>
    %cst_50 = arith.constant 0.000000e+00 : f32
    %89 = vector.broadcast %cst_50 : f32 to vector<8x64xf32>
    %90 = arith.maximumf %88, %89 : vector<8x64xf32>
    %c0_51 = arith.constant 0 : index
    %c0_52 = arith.constant 0 : index
    %91 = vector.load %arg16[%c0_51, %c0_52] : memref<64x32xf32, #tpu.memory_space<vmem>>, vector<64x32xf32>
    %cst_53 = arith.constant dense<0.000000e+00> : vector<8x32xf32>
    %92 = tpu.matmul %90, %91, %cst_53 {dimension_numbers = #tpu.dot_dimension_numbers<[1], [0], [0], [1], [0, 0, 1, 1], [], []>} : vector<8x64xf32>, vector<64x32xf32>, vector<8x32xf32> -> vector<8x32xf32>
    %c0_54 = arith.constant 0 : index
    %c0_55 = arith.constant 0 : index
    %93 = vector.load %arg17[%c0_54, %c0_55] : memref<1x32xf32, #tpu.memory_space<vmem>>, vector<1x32xf32>
    %94 = vector.broadcast %93 : vector<1x32xf32> to vector<8x32xf32>
    %95 = arith.addf %92, %94 : vector<8x32xf32>
    %96 = arith.addf %83, %95 : vector<8x32xf32>
    %c0_56 = arith.constant 0 : index
    %c0_57 = arith.constant 0 : index
    %97 = vector.load %arg18[%c0_56, %c0_57] : memref<1x32xf32, #tpu.memory_space<vmem>>, vector<1x32xf32>
    %c0_58 = arith.constant 0 : index
    %c0_59 = arith.constant 0 : index
    %98 = vector.load %arg19[%c0_58, %c0_59] : memref<1x32xf32, #tpu.memory_space<vmem>>, vector<1x32xf32>
    %cst_60 = arith.constant dense<0.000000e+00> : vector<8xf32>
    %99 = vector.multi_reduction <add>, %96, %cst_60 [1] : vector<8x32xf32> to vector<8xf32>
    %100 = vector.shape_cast %99 : vector<8xf32> to vector<8x1xf32>
    %cst_61 = arith.constant 3.200000e+01 : f32
    %101 = vector.broadcast %cst_61 : f32 to vector<8x1xf32>
    %102 = arith.divf %100, %101 : vector<8x1xf32>
    %103 = vector.broadcast %102 : vector<8x1xf32> to vector<8x32xf32>
    %104 = arith.subf %96, %103 : vector<8x32xf32>
    %105 = arith.mulf %104, %104 : vector<8x32xf32>
    %cst_62 = arith.constant dense<0.000000e+00> : vector<8xf32>
    %106 = vector.multi_reduction <add>, %105, %cst_62 [1] : vector<8x32xf32> to vector<8xf32>
    %107 = vector.shape_cast %106 : vector<8xf32> to vector<8x1xf32>
    %cst_63 = arith.constant 3.200000e+01 : f32
    %108 = vector.broadcast %cst_63 : f32 to vector<8x1xf32>
    %109 = arith.divf %107, %108 : vector<8x1xf32>
    %cst_64 = arith.constant 9.99999974E-6 : f32
    %110 = vector.broadcast %cst_64 : f32 to vector<8x1xf32>
    %111 = arith.addf %109, %110 : vector<8x1xf32>
    %112 = math.rsqrt %111 : vector<8x1xf32>
    %113 = vector.broadcast %112 : vector<8x1xf32> to vector<8x32xf32>
    %114 = arith.mulf %104, %113 : vector<8x32xf32>
    %115 = vector.broadcast %97 : vector<1x32xf32> to vector<8x32xf32>
    %116 = arith.mulf %114, %115 : vector<8x32xf32>
    %117 = vector.broadcast %98 : vector<1x32xf32> to vector<8x32xf32>
    %118 = arith.addf %116, %117 : vector<8x32xf32>
    %c0_65 = arith.constant 0 : index
    %c0_66 = arith.constant 0 : index
    %c0_67 = arith.constant 0 : index
    %119 = vector.load %arg20[%c0_65, %c0_66, %c0_67] : memref<1x8x32xf32, #tpu.memory_space<vmem>>, vector<1x8x32xf32>
    %120 = vector.shape_cast %119 : vector<1x8x32xf32> to vector<8x32xf32>
    %121 = vector.shape_cast %118 : vector<8x32xf32> to vector<1x8x32xf32>
    tpu.vector_store %arg20[%c0_65, %c0_66, %c0_67], %121 {strides = array<i32>} : memref<1x8x32xf32, #tpu.memory_space<vmem>>, vector<1x8x32xf32>,
    return
  }
  func.func @transform_0(%arg0: i32) -> (i32, i32, i32) {
    %c0_i32 = arith.constant 0 : i32
    %c0_i32_0 = arith.constant 0 : i32
    %c0_i32_1 = arith.constant 0 : i32
    return %arg0, %c0_i32, %c0_i32_0 : i32, i32, i32
  }
  func.func @transform_1(%arg0: i32) -> (i32, i32, i32) {
    %c0_i32 = arith.constant 0 : i32
    %c0_i32_0 = arith.constant 0 : i32
    %c0_i32_1 = arith.constant 0 : i32
    return %arg0, %c0_i32, %c0_i32_0 : i32, i32, i32
  }
  func.func @transform_2(%arg0: i32) -> (i32, i32, i32) {
    %c0_i32 = arith.constant 0 : i32
    %c0_i32_0 = arith.constant 0 : i32
    %c0_i32_1 = arith.constant 0 : i32
    return %arg0, %c0_i32, %c0_i32_0 : i32, i32, i32
  }
  func.func @transform_3(%arg0: i32) -> (i32, i32) {
    %c0_i32 = arith.constant 0 : i32
    %c0_i32_0 = arith.constant 0 : i32
    %c0_i32_1 = arith.constant 0 : i32
    return %c0_i32, %c0_i32_0 : i32, i32
  }
  func.func @transform_4(%arg0: i32) -> (i32, i32) {
    %c0_i32 = arith.constant 0 : i32
    %c0_i32_0 = arith.constant 0 : i32
    %c0_i32_1 = arith.constant 0 : i32
    return %c0_i32, %c0_i32_0 : i32, i32
  }
  func.func @transform_5(%arg0: i32) -> (i32, i32) {
    %c0_i32 = arith.constant 0 : i32
    %c0_i32_0 = arith.constant 0 : i32
    %c0_i32_1 = arith.constant 0 : i32
    return %c0_i32, %c0_i32_0 : i32, i32
  }
  func.func @transform_6(%arg0: i32) -> (i32, i32) {
    %c0_i32 = arith.constant 0 : i32
    %c0_i32_0 = arith.constant 0 : i32
    %c0_i32_1 = arith.constant 0 : i32
    return %c0_i32, %c0_i32_0 : i32, i32
  }
  func.func @transform_7(%arg0: i32) -> (i32, i32) {
    %c0_i32 = arith.constant 0 : i32
    %c0_i32_0 = arith.constant 0 : i32
    %c0_i32_1 = arith.constant 0 : i32
    return %c0_i32, %c0_i32_0 : i32, i32
  }
  func.func @transform_8(%arg0: i32) -> (i32, i32) {
    %c0_i32 = arith.constant 0 : i32
    %c0_i32_0 = arith.constant 0 : i32
    %c0_i32_1 = arith.constant 0 : i32
    return %c0_i32, %c0_i32_0 : i32, i32
  }
  func.func @transform_9(%arg0: i32) -> (i32, i32) {
    %c0_i32 = arith.constant 0 : i32
    %c0_i32_0 = arith.constant 0 : i32
    %c0_i32_1 = arith.constant 0 : i32
    return %c0_i32, %c0_i32_0 : i32, i32
  }
  func.func @transform_10(%arg0: i32) -> (i32, i32) {
    %c0_i32 = arith.constant 0 : i32
    %c0_i32_0 = arith.constant 0 : i32
    %c0_i32_1 = arith.constant 0 : i32
    return %c0_i32, %c0_i32_0 : i32, i32
  }
  func.func @transform_11(%arg0: i32) -> (i32, i32) {
    %c0_i32 = arith.constant 0 : i32
    %c0_i32_0 = arith.constant 0 : i32
    %c0_i32_1 = arith.constant 0 : i32
    return %c0_i32, %c0_i32_0 : i32, i32
  }
  func.func @transform_12(%arg0: i32) -> (i32, i32) {
    %c0_i32 = arith.constant 0 : i32
    %c0_i32_0 = arith.constant 0 : i32
    %c0_i32_1 = arith.constant 0 : i32
    return %c0_i32, %c0_i32_0 : i32, i32
  }
  func.func @transform_13(%arg0: i32) -> (i32, i32) {
    %c0_i32 = arith.constant 0 : i32
    %c0_i32_0 = arith.constant 0 : i32
    %c0_i32_1 = arith.constant 0 : i32
    return %c0_i32, %c0_i32_0 : i32, i32
  }
  func.func @transform_14(%arg0: i32) -> (i32, i32) {
    %c0_i32 = arith.constant 0 : i32
    %c0_i32_0 = arith.constant 0 : i32
    %c0_i32_1 = arith.constant 0 : i32
    return %c0_i32, %c0_i32_0 : i32, i32
  }
  func.func @transform_15(%arg0: i32) -> (i32, i32) {
    %c0_i32 = arith.constant 0 : i32
    %c0_i32_0 = arith.constant 0 : i32
    %c0_i32_1 = arith.constant 0 : i32
    return %c0_i32, %c0_i32_0 : i32, i32
  }
  func.func @transform_16(%arg0: i32) -> (i32, i32) {
    %c0_i32 = arith.constant 0 : i32
    %c0_i32_0 = arith.constant 0 : i32
    %c0_i32_1 = arith.constant 0 : i32
    return %c0_i32, %c0_i32_0 : i32, i32
  }
  func.func @transform_17(%arg0: i32) -> (i32, i32) {
    %c0_i32 = arith.constant 0 : i32
    %c0_i32_0 = arith.constant 0 : i32
    %c0_i32_1 = arith.constant 0 : i32
    return %c0_i32, %c0_i32_0 : i32, i32
  }
  func.func @transform_18(%arg0: i32) -> (i32, i32) {
    %c0_i32 = arith.constant 0 : i32
    %c0_i32_0 = arith.constant 0 : i32
    %c0_i32_1 = arith.constant 0 : i32
    return %c0_i32, %c0_i32_0 : i32, i32
  }
  func.func @transform_19(%arg0: i32) -> (i32, i32, i32) {
    %c0_i32 = arith.constant 0 : i32
    %c0_i32_0 = arith.constant 0 : i32
    %c0_i32_1 = arith.constant 0 : i32
    return %arg0, %c0_i32, %c0_i32_0 : i32, i32, i32
  }
}

</mosaic_0001>

<bundles_post_ra>
// kernel: tpu_custom_call.1
= control target key start
LH: loop header
LB: loop body
LE: loop exit
PB: predicated region body
PF: predicated region fallthrough
CT: control target
= control target key end

     0   :  { %s3867_s0 = inlined_call_operand.hbm [shape: f32[2,8,32], index: 0, kind: input, shape index: {}]   ;;  %s3868_s1 = inlined_call_operand.hbm [shape: f32[2,8,32], index: 1, kind: input, shape index: {}]   ;;  %s3869_s2 = inlined_call_operand.hbm [shape: f32[2,8,32], index: 2, kind: input, shape index: {}]   ;;  %s3870_s3 = inlined_call_operand.vmem [shape: f32[32,32], index: 3, kind: input, shape index: {}]   ;;  %s3871_s4 = inlined_call_operand.vmem [shape: f32[32,32], index: 4, kind: input, shape index: {}]   ;;  %s3872_s5 = inlined_call_operand.vmem [shape: f32[32,32], index: 5, kind: input, shape index: {}]   ;;  %s3873_s6 = inlined_call_operand.hbm [shape: f32[32,32], index: 6, kind: input, shape index: {}]   ;;  %s3874_s7 = inlined_call_operand.vmem [shape: f32[1,32], index: 7, kind: input, shape index: {}]   ;;  %s3875_s8 = inlined_call_operand.vmem [shape: f32[1,32], index: 8, kind: input, shape index: {}]   ;;  %s3876_s9 = inlined_call_operand.vmem [shape: f32[1,32], index: 9, kind: input, shape index: {}]   ;;  %s3877_s10 = inlined_call_operand.vmem [shape: f32[1,32], index: 10, kind: input, shape index: {}]   ;;  %s3878_s11 = inlined_call_operand.vmem [shape: f32[1,32], index: 11, kind: input, shape index: {}]   ;;  %s3879_s12 = inlined_call_operand.vmem [shape: f32[1,32], index: 12, kind: input, shape index: {}]   ;;  %s3880_s13 = inlined_call_operand.hbm [shape: f32[32,64], index: 13, kind: input, shape index: {}]   ;;  %s3881_s14 = inlined_call_operand.vmem [shape: f32[1,64], index: 14, kind: input, shape index: {}]   ;;  %s3882_s15 = inlined_call_operand.vmem [shape: f32[64,32], index: 15, kind: input, shape index: {}]   ;;  %s3883_s16 = inlined_call_operand.vmem [shape: f32[1,32], index: 16, kind: input, shape index: {}]   ;;  %s3884_s17 = inlined_call_operand.vmem [shape: f32[1,32], index: 17, kind: input, shape index: {}]   ;;  %s3885_s18 = inlined_call_operand.vmem [shape: f32[1,32], index: 18, kind: input, shape index: {}]   ;;  %s3886_s19 = inlined_call_operand.hbm [shape: f32[2,8,32], index: 19, kind: output, shape index: {}]  }
   0x1   :  { %3914 = sst [smem:[#allocation22_spill]] %s3867_s0 }
   0x2   :  { %3915 = sst [smem:[#allocation23_spill]] %s3868_s1 }
   0x3   :  { %3916 = sst [smem:[#allocation24_spill]] %s3869_s2 }
   0x4   :  { %3917 = sst [smem:[#allocation25_spill]] %s3870_s3 }
   0x5   :  { %3918 = sst [smem:[#allocation26_spill]] %s3873_s6 }
   0x6   :  { %3919 = sst [smem:[#allocation27_spill]] %s3878_s11 }
   0x7   :  { %3920 = sst [smem:[#allocation28_spill]] %s3879_s12 }
   0x8   :  { %3921 = sst [smem:[#allocation29_spill]] %s3881_s14 }
   0x9   :  { %3922 = sst [smem:[#allocation30_spill]] %s3883_s16 }
   0xa   :  { %3923 = sst [smem:[#allocation31_spill]] %s3884_s17 }
   0xb   :  { %3924 = sst [smem:[#allocation32_spill]] %s3885_s18 }
   0xc   :  { %3925 = sst [smem:[#allocation33_spill]] %s3886_s19 }
   0xd   :  { %24 = vsyncpa [#allocation3], 0 }
   0xe   :  { %26 = vsyncpa [#allocation3 + $0x1], 0 }
   0xf   :  { %27 = vsyncpa [#allocation6], 0 }
  0x10   :  { %29 = vsyncpa [#allocation6 + $0x1], 0 }
  0x11   :  { %30 = vsyncpa [#allocation9], 0 }
  0x12   :  { %31 = vsyncpa [#allocation4], 0 }
  0x13   :  { %33 = vsyncpa [#allocation4 + $0x1], 0  ;;  %s3369_s0 = smov 0   ;;  %s3371_s30 = smov 0  }
  0x14   :  { %s3373_s20 = smov 0   ;;  %s3375_s21 = smov 0  }
  0x15 LB: > { %3926 = sst [smem:[#allocation16_spill]] %s3235_s0  ;;  %s3390_s1 = sadd.s32 4294967295, %s3247_s21   ;;  %s3247_s21 = sphi %s3375_s21, %s3974_s21   ;;  %s3243_s20 = sphi %s3373_s20, %s3978_s20   ;;  %s3239_s30 = sphi %s3371_s30, %s3977_s30   ;;  %s3235_s0 = sphi %s3369_s0, %s3976_s0  }
  0x16   : > { %3927 = sst [smem:[#allocation17_spill]] %s3247_s21  ;;  %s2658_s22 = sadd.s32 4294967294, %s3247_s21  }
  0x17   : > { %p59_p0 = scmp.ne.s32.totalorder %s3239_s30, %s3235_s0  ;;  %p3894_p1 = scmp.eq.s32.totalorder %s3390_s1, 0 }
  0x18   : > { %p477_p3 = scmp.eq.s32.totalorder %s2658_s22, 1  ;;  %p2659_p5 = scmp.ge.s32.totalorder %s3247_s21, 1 }
  0x19   : > { %p3399_p4 = por %p3894_p1, %p59_p0  ;;  %p484_p7 = scmp.lt.s32.totalorder %s3247_s21, 3 }
  0x1a   : > { %p3404_p6 = por %p477_p3, %p59_p0  ;;  %s3249_s25 = smov [#allocation8]  }
  0x1b   : > { %s3928_s2 = scalar_select %p3399_p4, 1, 0 }
  0x1c   : > { %s3929_s23 = scalar_select %p3404_p6, 1, 0 }
  0x1d   : > { %p3409_p8 = pnand %p2659_p5, %p484_p7  ;;  %s505_s3 = sshll.u32 %s3249_s25, 4  ;;  %s3413_s3 = int_to_ptr.vmem [resolvable:$true] %s505_s3 }
  0x1e   : > { %3930 = sst [smem:[#allocation18_spill]] %s3929_s23  ;;  %s3425_s27 = sadd.s32 1, %s3247_s21  }
  0x1f   : > { %s3931_s24 = scalar_select %p3409_p8, 1, 0 }
  0x20   : > { %p2932_p9 = pneg %p3409_p8  ;;  %3933 = sst [smem:[#allocation19_spill]] %s3425_s27 }
  0x21   : > { %s46_s28 = sadd.s32 1, %s3243_s20  ;;  %s43_s29 = ssub.s32 %s3247_s21, %s3425_s27 }
  0x22   : > { %p3420_p11 = pnand %p2932_p9, %p3894_p1  ;;  %s3934_s6 = sld [smem:[#allocation26_spill]] }
  0x24   : > { %s3932_s26 = scalar_select %p3420_p11, 1, 0 }
  0x25   : > { %p3903_p13 = pneg %p3420_p11 }
  0x28   : > { %s3027_s25 = scalar_lea.hbm %s3934_s6, 512 }
  0x29   : > { %p3028_p12 = scmp.ne.s32.totalorder %s3934_s6, %s3027_s25  ;;  %p3034_p5 = scmp.lt.u32.totalorder %s3027_s25, %s3934_s6 }
  0x2b   : > { %p3030_p0 = pnand %p3903_p13, %p3028_p12 }
  0x2d   : > { %p3031_p3 = pneg %p3030_p0 }
  0x2f   : > { %p3036_p7 = pnand %p3034_p5, %p3031_p3 }
  0x31   : > { %3039 = shalt.err (!%p3036_p7)
}
  0x32   : > { %s3040_s23 = scalar_lea.vmem %s3413_s3, 512  ;;  %p3048_p2 = scmp.lt.s32.totalorder %s3413_s3, %s3413_s3 }
  0x33   : > { %p3041_p9 = scmp.ne.s32.totalorder %s3413_s3, %s3040_s23  ;;  %p3049_p12 = scmp.lt.s32.totalorder %s3040_s23, %s3040_s23 }
  0x35   : > { %p3043_p10 = pnand %p3041_p9, %p3903_p13  ;;  %p3050_p0 = por %p3049_p12, %p3048_p2 }
  0x37   : > { %p3044_p1 = pneg %p3043_p10 }
  0x39   : > { %p3051_p6 = pnand %p3050_p0, %p3044_p1 }
  0x3b   : > { %3054 = shalt.err (!%p3051_p6)
}
  0x3c   : > { %s3897_s17 = smov 128   ;;  %s3898_s18 = smov 8  }
  0x3d   : > { %2935 = dma.hbm_to_vmem [thread:$0]  (!%p3420_p11), %s3934_s6, 512, %s3413_s3, [#allocation9], %s3897_s17, %s3897_s17, %s3898_s18  }
  0x3e   : > { %p44_p1 = scmp.eq.s32.totalorder %s43_s29, 0  ;;  %p53_p2 = scmp.ne.s32.totalorder %s3243_s20, %s3239_s30 }
  0x3f   : > { %p54_p6 = scmp.eq.s32.totalorder %s3247_s21, 0  ;;  %p2955_p10 = scmp.lt.s32.totalorder %s3247_s21, 2 }
  0x40   : > { %s3465_s22 = scalar_select %p44_p1, %s3243_s20, %s46_s28  }
  0x41   : > { %p55_p3 = por %p54_p6, %p53_p2  ;;  %p3936_p5 = scmp.eq.s32.totalorder %s3390_s1, 1 }
  0x42   : > { %3935 = sst [smem:[#allocation20_spill]] %s3465_s22  ;;  %s3899_s23 = sand.u32 1, %s3243_s20  }
  0x43   : > { %p3469_p7 = por %p3936_p5, %p53_p2  ;;  %s3475_s27 = sshll.u32 %s3247_s21, 7 }
  0x44   : > { %s3479_s16 = sshll.u32 %s3899_s23, 3  ;;  %p3481_p9 = pnand %p2955_p10, %p55_p3 }
  0x45   : > { %s3937_s25 = scalar_select %p3469_p7, 1, 0 }
  0x46   : > { %s3939_s3 = scalar_select %p3481_p9, 1, 0 }
  0x47   : > { %3938 = sst [smem:[#allocation21_spill]] %s3937_s25  ;;  %s583_s28 = sand.u32 1, %s3247_s21  }
  0x48   : > { %s3940_s0 = sld [smem:[#allocation23_spill]]  ;;  %s587_s6 = scalar_lea.vmem [#allocation5], %s3479_s16 }
  0x49   : > { %s594_s22 = sshll.u32 %s587_s6, 4  ;;  %s3495_s23 = scalar_lea.sflag [#allocation6], %s583_s28  ;;  %s3493_s22 = int_to_ptr.vmem [resolvable:$true] %s594_s22 }
  0x4a   : > { %p3501_p0 = pneg %p3481_p9 }
  0x4c   : > { %s3942_s21 = scalar_select %p3501_p0, 1, 0 }
  0x4e   : > { %s3941_s17 = smov %s3940_s0  ;;  %s3490_s18 = scalar_lea.hbm %s3940_s0, %s3475_s27 }
  0x4f   : > { %s3055_s25 = scalar_lea.hbm %s3490_s18, 128  ;;  %s3060_s0 = scalar_lea.hbm %s3941_s17, 256 }
  0x50   : > { %p3056_p12 = scmp.ne.s32.totalorder %s3490_s18, %s3055_s25  ;;  %p3061_p6 = scmp.lt.u32.totalorder %s3490_s18, %s3941_s17 }
  0x51   : > { %p3062_p10 = scmp.lt.u32.totalorder %s3060_s0, %s3055_s25  ;;  %p3064_p5 = scmp.lt.u32.totalorder %s3055_s25, %s3490_s18 }
  0x52   : > { %p3058_p1 = pnand %p3501_p0, %p3056_p12 }
  0x53   : > { %p3063_p3 = por %p3062_p10, %p3061_p6 }
  0x54   : > { %p3059_p2 = pneg %p3058_p1 }
  0x55   : > { %p3065_p13 = por %p3064_p5, %p3063_p3 }
  0x57   : > { %p3066_p7 = pnand %p3065_p13, %p3059_p2 }
  0x59   : > { %3069 = shalt.err (!%p3066_p7)
}
  0x5a   : > { %s3070_s28 = scalar_lea.vmem %s3493_s22, 128  ;;  %s3252_s29 = smov [#allocation5]  }
  0x5b   : > { %p3071_p12 = scmp.ne.s32.totalorder %s3493_s22, %s3070_s28  ;;  %s3075_s19 = sshll.u32 %s3252_s29, 4  ;;  %s3076_s19 = int_to_ptr.vmem [resolvable:$false] %s3075_s19 }
  0x5c   : > { %s3077_s14 = scalar_lea.vmem %s3076_s19, 256  ;;  %p3078_p8 = scmp.lt.s32.totalorder %s3493_s22, %s3076_s19 }
  0x5d   : > { %p3073_p1 = pnand %p3071_p12, %p3501_p0  ;;  %p3079_p11 = scmp.lt.s32.totalorder %s3077_s14, %s3070_s28 }
  0x5f   : > { %p3074_p4 = pneg %p3073_p1  ;;  %p3080_p6 = por %p3079_p11, %p3078_p8 }
  0x61   : > { %p3081_p10 = pnand %p3080_p6, %p3074_p4 }
  0x63   : > { %3084 = shalt.err (!%p3081_p10)
}
  0x64   : > { %2945 = dma.hbm_to_vmem [thread:$0]  (!%p3481_p9), %s3490_s18, 128, %s3493_s22, %s3495_s23  }
  0x65   : > { %s3253_s25 = smov [#allocation10]   ;;  %s3085_s29 = scalar_lea.hbm %s3880_s13, 512 }
  0x66   : > { %s536_s0 = sshll.u32 %s3253_s25, 4  ;;  %p3086_p8 = scmp.ne.s32.totalorder %s3880_s13, %s3085_s29  ;;  %s537_s0 = int_to_ptr.vmem [resolvable:$true] %s536_s0 }
  0x67   : > { %p3943_p4 = scmp.ne.s32.totalorder %s3932_s26, 0  ;;  %p3092_p2 = scmp.lt.u32.totalorder %s3085_s29, %s3880_s13 }
  0x69   : > { %p3944_p11 = pneg %p3943_p4 }
  0x6b   : > { %p3088_p13 = pnand %p3086_p8, %p3944_p11 }
  0x6d   : > { %p3089_p7 = pneg %p3088_p13 }
  0x6f   : > { %p3094_p3 = pnand %p3092_p2, %p3089_p7 }
  0x71   : > { %3097 = shalt.err (!%p3094_p3)
}
  0x72   : > { %s3098_s18 = scalar_lea.vmem %s537_s0, 512  ;;  %p3945_p12 = pmov %p3944_p11 }
  0x73   : > { %p3099_p5 = scmp.ne.s32.totalorder %s537_s0, %s3098_s18  ;;  %p3106_p10 = scmp.lt.s32.totalorder %s537_s0, %s537_s0 }
  0x74   : > { %p3107_p9 = scmp.lt.s32.totalorder %s3098_s18, %s3098_s18 }
  0x75   : > { %p3101_p1 = pnand %p3099_p5, %p3945_p12 }
  0x76   : > { %p3108_p0 = por %p3107_p9, %p3106_p10 }
  0x77   : > { %p3102_p6 = pneg %p3101_p1 }
  0x79   : > { %p3109_p8 = pnand %p3108_p0, %p3102_p6 }
  0x7b   : > { %3112 = shalt.err (!%p3109_p8)
}
  0x7c   : > { %s3946_s12 = smov 8   ;;  %s3947_s17 = smov 128  }
  0x7d   : > { %2938 = dma.hbm_to_vmem [thread:$0]  (!%p3943_p4), %s3880_s13, 512, %s537_s0, [#allocation9], %s3947_s17, %s3947_s17, %s3946_s12  }
  0x7e   : > { %s3948_s19 = sld [smem:[#allocation22_spill]]  ;;  %s569_s26 = scalar_lea.vmem [#allocation2], %s3479_s16 }
  0x7f   : > { %s576_s14 = sshll.u32 %s569_s26, 4  ;;  %s3949_s18 = sand.u32 1, %s3243_s20   ;;  %s577_s14 = int_to_ptr.vmem [resolvable:$true] %s576_s14 }
  0x80   : > { %s566_s11 = scalar_lea.sflag [#allocation3], %s3949_s18  ;;  %p3950_p0 = scmp.ne.s32.totalorder %s3942_s21, 0 }
  0x84   : > { %s3552_s28 = scalar_lea.hbm %s3948_s19, %s3475_s27  ;;  %s3118_s17 = scalar_lea.hbm %s3948_s19, 256 }
  0x85   : > { %s3113_s22 = scalar_lea.hbm %s3552_s28, 128  ;;  %p3119_p4 = scmp.lt.u32.totalorder %s3552_s28, %s3948_s19 }
  0x86   : > { %p3114_p9 = scmp.ne.s32.totalorder %s3552_s28, %s3113_s22  ;;  %p3120_p7 = scmp.lt.u32.totalorder %s3118_s17, %s3113_s22 }
  0x87   : > { %p3122_p3 = scmp.lt.u32.totalorder %s3113_s22, %s3552_s28 }
  0x88   : > { %p3116_p11 = pnand %p3114_p9, %p3950_p0  ;;  %p3121_p2 = por %p3120_p7, %p3119_p4 }
  0x8a   : > { %p3117_p13 = pneg %p3116_p11  ;;  %p3123_p5 = por %p3122_p3, %p3121_p2 }
  0x8c   : > { %p3124_p12 = pnand %p3123_p5, %p3117_p13 }
  0x8e   : > { %3127 = shalt.err (!%p3124_p12)
}
  0x8f   : > { %s3128_s29 = scalar_lea.vmem %s577_s14, 128  ;;  %s3254_s26 = smov [#allocation2]  }
  0x90   : > { %p3129_p1 = scmp.ne.s32.totalorder %s577_s14, %s3128_s29  ;;  %s3133_s18 = sshll.u32 %s3254_s26, 4  ;;  %s3134_s18 = int_to_ptr.vmem [resolvable:$false] %s3133_s18 }
  0x91   : > { %s3135_s0 = scalar_lea.vmem %s3134_s18, 256  ;;  %p3136_p8 = scmp.lt.s32.totalorder %s577_s14, %s3134_s18 }
  0x92   : > { %p3131_p6 = pnand %p3129_p1, %p3950_p0  ;;  %p3137_p9 = scmp.lt.s32.totalorder %s3135_s0, %s3128_s29 }
  0x94   : > { %p3132_p10 = pneg %p3131_p6  ;;  %p3138_p11 = por %p3137_p9, %p3136_p8 }
  0x96   : > { %p3139_p4 = pnand %p3138_p11, %p3132_p10 }
  0x98   : > { %3142 = shalt.err (!%p3139_p4)
}
  0x99   : > { %p3951_p7 = scmp.ne.s32.totalorder %s3939_s3, 0  ;;  %s3952_s17 = sld [smem:[#allocation24_spill]] }
  0x9a   : > { %s605_s6 = scalar_lea.vmem [#allocation7], %s3479_s16 }
  0x9b   : > { %2942 = dma.hbm_to_vmem [thread:$0]  (!%p3951_p7), %s3552_s28, 128, %s577_s14, %s566_s11  }
  0x9c   : > { %s612_s29 = sshll.u32 %s605_s6, 4  ;;  %s613_s29 = int_to_ptr.vmem [resolvable:$true] %s612_s29 }
  0x9f   : > { %s3578_s25 = scalar_lea.hbm %s3952_s17, %s3475_s27  ;;  %s3148_s11 = scalar_lea.hbm %s3952_s17, 256 }
  0xa0   : > { %s3143_s26 = scalar_lea.hbm %s3578_s25, 128  ;;  %p3149_p5 = scmp.lt.u32.totalorder %s3578_s25, %s3952_s17 }
  0xa1   : > { %p3144_p13 = scmp.ne.s32.totalorder %s3578_s25, %s3143_s26  ;;  %p3150_p12 = scmp.lt.u32.totalorder %s3148_s11, %s3143_s26 }
  0xa2   : > { %p3152_p6 = scmp.lt.u32.totalorder %s3143_s26, %s3578_s25 }
  0xa3   : > { %p3146_p2 = pnand %p3144_p13, %p3950_p0  ;;  %p3151_p1 = por %p3150_p12, %p3149_p5 }
  0xa5   : > { %p3147_p3 = pneg %p3146_p2  ;;  %p3153_p10 = por %p3152_p6, %p3151_p1 }
  0xa7   : > { %p3154_p8 = pnand %p3153_p10, %p3147_p3 }
  0xa9   : > { %3157 = shalt.err (!%p3154_p8)
}
  0xaa   : > { %s3158_s16 = scalar_lea.vmem %s613_s29, 128  ;;  %s3255_s27 = smov [#allocation7]  }
  0xab   : > { %p3159_p9 = scmp.ne.s32.totalorder %s613_s29, %s3158_s16  ;;  %s3163_s22 = sshll.u32 %s3255_s27, 4  ;;  %s3164_s22 = int_to_ptr.vmem [resolvable:$false] %s3163_s22 }
  0xac   : > { %s3165_s12 = scalar_lea.vmem %s3164_s22, 256  ;;  %p3166_p13 = scmp.lt.s32.totalorder %s613_s29, %s3164_s22 }
  0xad   : > { %p3161_p11 = pnand %p3159_p9, %p3950_p0  ;;  %p3167_p2 = scmp.lt.s32.totalorder %s3165_s12, %s3158_s16 }
  0xaf   : > { %p3162_p4 = pneg %p3161_p11  ;;  %p3168_p7 = por %p3167_p2, %p3166_p13 }
  0xb1   : > { %p3169_p5 = pnand %p3168_p7, %p3162_p4 }
  0xb3   : > { %3172 = shalt.err (!%p3169_p5)
}
  0xb4   : > { %p3953_p12 = scmp.ne.s32.totalorder %s3939_s3, 0  ;;  %p3954_p3 = scmp.ne.s32.totalorder %s3931_s24, 0 }
  0xb5   : > { %s3602_s21 = sand.u32 (!%p3954_p3), 1, %s3239_s30   ;;  %p3955_p0 = scmp.ne.s32.totalorder (!%p3954_p3), %s3928_s2, 0 }
  0xb6   : > { %2948 = dma.hbm_to_vmem [thread:$0]  (!%p3953_p12), %s3578_s25, 128, %s613_s29, %s3495_s23  }
  0xb7   : > { %621 = sbr.rel (%p3954_p3) target bundleno = 3016 (0xbc8), region = 96  ;;  %s3605_s6 = sshll.u32 (!%p3954_p3), %s3602_s21, 3 }
  0xb8   : > { %s624_s26 = scalar_lea.sflag (!%p3954_p3), [#allocation3], %s3602_s21  ;;  %s627_s18 = scalar_lea.vmem (!%p3954_p3), [#allocation2], %s3605_s6 }
  0xbe   : > { %3218 = dma.done.wait (%p3955_p0), %s624_s26, 128  }
  0xbf   : > { %3220 = vsyncadd (%p3955_p0), %s624_s26, 4294967168  ;;  %s632_s24 = sand.u32 1, %s3390_s1   ;;  %s636_s3 = scalar_lea.vmem [#allocation5], %s3605_s6 }
  0xc0   : > { %s633_s23 = scalar_lea.sflag [#allocation6], %s632_s24 }
  0xc1   : > { %3222 = dma.done.wait (%p3955_p0), %s633_s23, 256  }
  0xc2   : > { %3224 = vsyncadd (%p3955_p0), %s633_s23, 4294967040  ;;  %s645_s25 = scalar_lea.vmem [#allocation7], %s3605_s6  ;;  %p3956_p7 = scmp.eq.s32.totalorder %s3390_s1, 0 }
  0xc4   : > { %3226 = dma.done.wait (%p3956_p7), [#allocation9], 1024   ;;  %p3957_p1 = pmov %p3956_p7 }
  0xc5   : > { %v3256_v0 = vmov 0.0|0.0   ;;  %vm3257_vm0 = vmmov 0   ;;  %v3258_v1 = vmov 0.0   ;;  %s3958_s0 = sld [smem:[#allocation25_spill]]  ;;  %v806_v8 = vld [vmem:[%s3871_s4] sm:$0xff]  ;;  %v807_v9 = vld [vmem:[%s3871_s4 + $0x8] sm:$0xff]  ;;  %v1422_v43 = vlaneseq }
  0xc6   : > { %3228 = vsyncadd (%p3957_p1), [#allocation9], 4294966272  ;;  %2874 = vmatprep.subr.bf16.mxu1 %v3256_v0  ;;  %2768 = vmatprep.mubr.msk.f32.mxu1 %vm3257_vm0, %v3258_v1  ;;  %v3649_v10 = vld [vmem:[%s627_s18] sm:$0xff]  ;;  %vm732_vm1 = vcmask 261120   ;;  %v2881_v11 = vpack.c.bf16 %v807_v9, %v806_v8  ;;  %v808_v12 = vld [vmem:[%s3871_s4 + $0x10] sm:$0xff]  ;;  %s3260_s12 = smov 120  }
  0xc7   : > { %2886 = vmatprep.subr.bf16.mxu0 %v3256_v0  ;;  %2790 = vmatprep.mubr.msk.f32.mxu0 %vm3257_vm0, %v3258_v1  ;;  %v809_v13 = vld [vmem:[%s3871_s4 + $0x18] sm:$0xff]  ;;  %v2678_v18 = vld [vmem:[%s3875_s8] ss:$0 sm:$0xff]  ;;  %s3261_s26 = smov 112   ;;  %v891_v25 = vld [vmem:[%s3872_s5 + $0x8] sm:$0xff]  ;;  %vm1129_vm2 = vcmask 64512  }
  0xc8   : > { %v2884_v14 = vpack.c.bf16 %v809_v13, %v808_v12  ;;  %v719_v15 = vld [vmem:[%s636_s3] sm:$0xff]  ;;  %v2676_v22 = vld [vmem:[%s3874_s7] ss:$0 sm:$0xff]  ;;  %s3259_s3 = smov 104   ;;  %v3716_v44 = vshrl.u32 %v1422_v43, 7  ;;  %v1425_v45 = vand.u32 127, %v1422_v43 }
  0xc9   : > { %v890_v24 = vld [vmem:[%s3872_s5] sm:$0xff]  ;;  %v892_v26 = vld [vmem:[%s3872_s5 + $0x10] sm:$0xff]  ;;  %v893_v28 = vld [vmem:[%s3872_s5 + $0x18] sm:$0xff]  ;;  %v3262_v48 = vmov -1e+32   ;;  %s3265_s27 = smov 16  }
  0xca   : > { %v2887_v27 = vpack.c.bf16 %v891_v25, %v890_v24  ;;  %v2890_v29 = vpack.c.bf16 %v893_v28, %v892_v26  ;;  %v720_v31 = vld [vmem:[%s645_s25] sm:$0xff]  ;;  %v1426_v46 = vsub.s32 %v1425_v45, %v3716_v44  ;;  %s3266_s22 = smov 8   ;;  %vm2186_vm4 = vcmask 130048   ;;  %s3961_s2 = sld [smem:[#allocation28_spill]] }
  0xcb   : > { %s3959_s11 = smov %s3958_s0  ;;  %v721_v2 = vld [vmem:[%s3958_s0] sm:$0xff]  ;;  %vm2188_vm5 = vcmask 195584   ;;  %vm2190_vm6 = vcmp.eq.s32.totalorder %v3716_v44, 0  ;;  %s3962_s16 = sld [smem:[#allocation29_spill]]  ;;  %vm2407_vm7 = vcmask 523264  }
  0xcc   : > { %v722_v3 = vld [vmem:[%s3959_s11 + $0x8] sm:$0xff]  ;;  %v723_v4 = vld [vmem:[%s3959_s11 + $0x10] sm:$0xff]  ;;  %v724_v6 = vld [vmem:[%s3959_s11 + $0x18] sm:$0xff]  ;;  %2888 = vmatpush3.bf16.msra.mxu0 %v2887_v27  ;;  %vm1427_vm3 = vcmp.lt.s32.totalorder %v1426_v46, 0  ;;  %s3965_s23 = sld [smem:[#allocation31_spill]]  ;;  %s3966_s0 = sld [smem:[#allocation32_spill]] }
  0xcd   : > { %v2875_v5 = vpack.c.bf16 %v722_v3, %v721_v2  ;;  %v2878_v7 = vpack.c.bf16 %v724_v6, %v723_v4  ;;  %2889 = vmatprep.subr.bf16.mxu0 %v3256_v0  ;;  %v1428_v49 = vsel %vm1427_vm3, 0.0, %v3262_v48  ;;  %s2707_s28 = sshll.u32 %s3390_s1, 7  ;;  %s717_s14 = scalar_lea.vmem [#allocation11], %s3605_s6 }
  0xce   : > { %s2526_s18 = sshll.u32 %s717_s14, 4  ;;  %s3268_s1 = smov [#allocation11]   ;;  %s3824_s18 = int_to_ptr.vmem [resolvable:$true] %s2526_s18 }
  0xcf   : > { %2876 = vmatpush3.bf16.msra.mxu1 %v2875_v5  ;;  %s3177_s6 = sshll.u32 %s3268_s1, 4  ;;  %s3178_s6 = int_to_ptr.vmem [resolvable:$false] %s3177_s6 }
  0xd0   : > { %2877 = vmatprep.subr.bf16.mxu1 %v3256_v0  ;;  %2891 = vmatpush3.bf16.msra.mxu0 %v2890_v29  ;;  %s3179_s24 = scalar_lea.vmem %s3178_s6, 256  ;;  %p3180_p11 = scmp.lt.s32.totalorder %s3824_s18, %s3178_s6 }
  0xd1   : > { %2803 = vmatprep.subr.mxu0 %v3258_v1 }
  0xd3   : > { %2879 = vmatpush3.bf16.msra.mxu1 %v2878_v7  ;;  %2791 = vmatmul.mubr.msk.f32.vlgmr.msra.gmra.mrb[0].mxu0 %vm732_vm1, %v720_v31  ;;  %v2680_v7 = vld [vmem:[%s3876_s9] ss:$0 sm:$0xff] }
  0xd4   : > { %2880 = vmatprep.subr.bf16.mxu1 %v3256_v0  ;;  %2805 = vmatprep.mubr.msk.f32.mxu0 %vm3257_vm0, %v3258_v1 }
  0xd6   : > { %2769 = vmatmul.mubr.msk.f32.vlgmr.msra.gmra.mrb[0].mxu1 %vm732_vm1, %v3649_v10 }
  0xd7   : > { %2882 = vmatpush3.bf16.msra.mxu1 %v2881_v11  ;;  %2779 = vmatprep.mubr.msk.f32.mxu1 %vm3257_vm0, %v3258_v1 }
  0xd8   : > { %2883 = vmatprep.subr.bf16.mxu1 %v3256_v0 }
  0xdb   : > { %2885 = vmatpush3.bf16.msra.mxu1 %v2884_v14 }
  0xdc   : > { %2793 = vmatprep.subr.mxu1 %v3258_v1 }
  0xde   : > { %2780 = vmatmul.mubr.msk.f32.vlgmr.msra.gmra.mrb[2].mxu1 %vm732_vm1, %v719_v15 }
  0xdf   : > { %2795 = vmatprep.mubr.msk.f32.mxu1 %vm3257_vm0, %v3258_v1 }
 0x1a6   : > { %v970_v41 = vpop.f32.mrb[0].mxu0 }
 0x1a7   : > { %v2792_v42 = vpop.f32.mrb[1].mxu0  ;;  %v971_v8 = vadd.f32 %v2680_v7, %v970_v41 }
 0x1a9   : > { %v802_v16 = vpop.f32.mrb[0].mxu1 }
 0x1aa   : > { %v2770_v17 = vpop.f32.mrb[1].mxu1  ;;  %v803_v23 = vadd.f32 %v2676_v22, %v802_v16 }
 0x1b1   : > { %v886_v19 = vpop.f32.mrb[2].mxu1 }
 0x1b2   : > { %v887_v20 = vadd.f32 %v2678_v18, %v886_v19  ;;  %v2781_v21 = vpop.f32.mrb[3].mxu1 }
 0x1b4   : > { %988 = vrot.lane.b32.xlu1 %v887_v20, %s3259_s3  ;;  %982 = vrot.lane.b32.xlu0 %v887_v20, %s3260_s12 }
 0x1b8   : > { %975 = vrot.lane.b32.xlu1 %v803_v23, %s3260_s12  ;;  %985 = vrot.lane.b32.xlu0 %v887_v20, %s3261_s26 }
 0x1bc   : > { %979 = vrot.lane.b32.xlu1 %v803_v23, %s3259_s3  ;;  %977 = vrot.lane.b32.xlu0 %v803_v23, %s3261_s26 }
 0x1da   : > { %1001 = vxpose.xlu0.b32.start.end [1/1] (short) (narrow) %v887_v20, 8 }
 0x226   : > { %v983_v30 = vpop.permute.xlu0 %982  ;;  %v989_v33 = vpop.permute.xlu1 %988 }
 0x227   : > { %1033 = vxpose.xlu1.b32.start.end [1/1] (short) (narrow) %v983_v30, 8 }
 0x22a   : > { %v986_v32 = vpop.permute.xlu0 %985  ;;  %v976_v36 = vpop.permute.xlu1 %975 }
 0x22b   : > { %1065 = vxpose.xlu0.b32.start.end [1/1] (short) (narrow) %v986_v32, 8 }
 0x22e   : > { %v978_v34 = vpop.permute.xlu0 %977  ;;  %v980_v37 = vpop.permute.xlu1 %979 }
 0x22f   : > { %1097 = vxpose.xlu0.b32.start.end [1/1] (short) (narrow) %v989_v33, 8 }
 0x25a   : > { %v1017_v35 = vpop.trf.xlu0 }
 0x25b   : > { %2794 = vmatpush3.msra.mxu1 %v1017_v35 }
 0x25c   : > { %2796 = vmatmul.mubr.msk.f32.vlgmr.msra.gmra.mrb[4].mxu1 %vm1129_vm2, %v803_v23  ;;  %2798 = vmatprep.subr.mxu1 %v3258_v1 }
 0x25d   : > { %2800 = vmatprep.mubr.msk.f32.mxu1 %vm3257_vm0, %v3258_v1 }
 0x2a7   : > { %v1049_v38 = vpop.trf.xlu1 }
 0x2a8   : > { %2799 = vmatpush3.msra.mxu1 %v1049_v38 }
 0x2a9   : > { %2801 = vmatmul.mubr.msk.f32.vlgmr.msra.gmra.mrb[6].mxu1 %vm1129_vm2, %v976_v36  ;;  %2808 = vmatprep.subr.mxu1 %v3258_v1 }
 0x2aa   : > { %2810 = vmatprep.mubr.msk.f32.mxu1 %vm3257_vm0, %v3258_v1 }
 0x2ab   : > { %v1081_v39 = vpop.trf.xlu0 }
 0x2ac   : > { %2804 = vmatpush3.msra.mxu0 %v1081_v39 }
 0x2ad   : > { %2806 = vmatmul.mubr.msk.f32.vlgmr.msra.gmra.mrb[2].mxu0 %vm1129_vm2, %v978_v34  ;;  %2813 = vmatprep.subr.mxu0 %v3258_v1 }
 0x2ae   : > { %2815 = vmatprep.mubr.msk.f32.mxu0 %vm3257_vm0, %v3258_v1 }
 0x2af   : > { %v1113_v40 = vpop.trf.xlu0 }
 0x2b0   : > { %2809 = vmatpush3.msra.mxu1 %v1113_v40 }
 0x2b1   : > { %2811 = vmatmul.mubr.msk.f32.vlgmr.msra.gmra.mrb[8].mxu1 %vm1129_vm2, %v980_v37  ;;  %2818 = vmatprep.subr.mxu1 %v3258_v1 }
 0x2b2   : > { %2820 = vmatprep.mubr.msk.f32.mxu1 %vm3257_vm0, %v3258_v1 }
 0x32f   : > { %v1198_v47 = vpop.f32.mrb[4].mxu1 }
 0x330   : > { %v1418_v50 = vmul.f32 0.35355338, %v1198_v47  ;;  %v2797_v51 = vpop.f32.mrb[5].mxu1 }
 0x332   : > { %v1429_v52 = vadd.f32 %v1428_v49, %v1418_v50 }
 0x334   : > { %v1433_v53 = vsel %vm1129_vm2, %v1429_v52, -inf }
 0x335   : > { %1434 = vmax.xlane.f32.xlu0 %v1433_v53 }
 0x37c   : > { %v1270_v54 = vpop.f32.mrb[6].mxu1 }
 0x37d   : > { %v1419_v55 = vmul.f32 0.35355338, %v1270_v54  ;;  %v2802_v56 = vpop.f32.mrb[7].mxu1 }
 0x37f   : > { %v1430_v57 = vadd.f32 %v1428_v49, %v1419_v55 }
 0x380   : > { %v1342_v58 = vpop.f32.mrb[2].mxu0 }
 0x381   : > { %v1420_v59 = vmul.f32 0.35355338, %v1342_v58  ;;  %v2807_v60 = vpop.f32.mrb[3].mxu0  ;;  %v1436_v61 = vsel %vm1129_vm2, %v1430_v57, -inf  ;;  %v2192_v58 = vld [vmem:[#allocation8] sm:$0xff] }
 0x382   : > { %1437 = vmax.xlane.f32.xlu1 %v1436_v61 }
 0x383   : > { %v1431_v62 = vadd.f32 %v1428_v49, %v1420_v59  ;;  %v2193_v59 = vld [vmem:[#allocation8 + $0x8] sm:$0xff] }
 0x384   : > { %v1414_v63 = vpop.f32.mrb[8].mxu1  ;;  %v2893_v60 = vpack.c.bf16 %v2193_v59, %v2192_v58  ;;  %v2696_v59 = vld [vmem:[%s3877_s10] ss:$0 sm:$0xff] }
 0x385   : > { %v1421_v2 = vmul.f32 0.35355338, %v1414_v63  ;;  %v2812_v3 = vpop.f32.mrb[9].mxu1  ;;  %v1439_v4 = vsel %vm1129_vm2, %v1431_v62, -inf }
 0x386   : > { %1440 = vmax.xlane.f32.xlu1 %v1439_v4 }
 0x387   : > { %v1432_v5 = vadd.f32 %v1428_v49, %v1421_v2  ;;  %v3264_v2 = vmov 1934713408  }
 0x388   : > { %v2072_v3 = vunpack.c.l.s4 %v3264_v2 }
 0x389   : > { %v1442_v6 = vsel %vm1129_vm2, %v1432_v5, -inf }
 0x38a   : > { %1443 = vmax.xlane.f32.xlu0 %v1442_v6  ;;  %v2073_v7 = vunpack.c.0.s8 %v2072_v3 }
 0x397   : > { %992 = vrot.lane.b32.xlu1 %v971_v8, %s3260_s12  ;;  %s3964_s12 = sld [smem:[#allocation21_spill]] }
 0x39b   : > { %998 = vrot.lane.b32.xlu1 %v971_v8, %s3259_s3  ;;  %s3267_s3 = smov 24  }
 0x39d   : > { %p3968_p10 = scmp.ne.s32.totalorder %s3964_s12, 0 }
 0x3a0   : > { %995 = vrot.lane.b32.xlu0 %v971_v8, %s3261_s26  ;;  %s3960_s26 = sld [smem:[#allocation27_spill]] }
 0x3c2   : > { %v1435_v9 = vpop.xlane.xlu0 %1434 }
 0x3c3   : > { %v1445_v11 = vsub.f32 %v1429_v52, %v1435_v9 }
 0x3c5   : > { %v1449_v12 = vmul.f32 1.442695, %v1445_v11 }
 0x3c7   : > { %3007 = vpow2.f32 %v1449_v12 }
 0x3d1   : > { %v3008_v13 = vpop.eup %3007 }
 0x3d2   : > { %v1457_v14 = vsel %vm1129_vm2, %v3008_v13, 0.0 }
 0x3d3   : > { %1458 = vadd.xlane.f32.xlu1 %v1457_v14 }
 0x40f   : > { %v1438_v15 = vpop.xlane.xlu1 %1437 }
 0x410   : > { %v1446_v16 = vsub.f32 %v1430_v57, %v1438_v15  ;;  %v2076_v15 = vsub.s32 %v2073_v7, %v3716_v44  ;;  %v2308_v7 = vld [vmem:[#allocation10 + $0x8] sm:$0xff] }
 0x412   : > { %v1451_v17 = vmul.f32 1.442695, %v1446_v16 }
 0x413   : > { %v1441_v18 = vpop.xlane.xlu1 %1440 }
 0x414   : > { %3009 = vpow2.f32 %v1451_v17  ;;  %v1447_v19 = vsub.f32 %v1431_v62, %v1441_v18  ;;  %v3263_v62 = vmov 1983009808  }
 0x415   : > { %v2040_v63 = vunpack.c.l.s4 %v3263_v62 }
 0x416   : > { %v1453_v20 = vmul.f32 1.442695, %v1447_v19 }
 0x417   : > { %v1444_v21 = vpop.xlane.xlu0 %1443  ;;  %v993_v30 = vpop.permute.xlu1 %992  ;;  %v2041_v4 = vunpack.c.0.s8 %v2040_v63 }
 0x418   : > { %3011 = vpow2.f32 %v1453_v20  ;;  %v1448_v22 = vsub.f32 %v1432_v5, %v1444_v21 }
 0x41a   : > { %v1455_v23 = vmul.f32 1.442695, %v1448_v22 }
 0x41b   : > { %v996_v31 = vpop.permute.xlu0 %995  ;;  %v999_v32 = vpop.permute.xlu1 %998 }
 0x41c   : > { %3013 = vpow2.f32 %v1455_v23 }
 0x41e   : > { %v3010_v24 = vpop.eup %3009 }
 0x41f   : > { %v1460_v25 = vsel %vm1129_vm2, %v3010_v24, 0.0 }
 0x420   : > { %1461 = vadd.xlane.f32.xlu0 %v1460_v25  ;;  %v2195_v25 = vld [vmem:[#allocation8 + $0x18] sm:$0xff] }
 0x422   : > { %v3012_v26 = vpop.eup %3011 }
 0x423   : > { %v1463_v27 = vsel %vm1129_vm2, %v3012_v26, 0.0 }
 0x424   : > { %1464 = vadd.xlane.f32.xlu0 %v1463_v27 }
 0x426   : > { %v3014_v28 = vpop.eup %3013 }
 0x427   : > { %v1466_v29 = vsel %vm1129_vm2, %v3014_v28, 0.0 }
 0x428   : > { %1467 = vadd.xlane.f32.xlu1 %v1466_v29 }
 0x451   : > { %1477 = vxpose.xlu0.b32.start.end [1/1] (short) (narrow) %v971_v8, 8  ;;  %v2044_v8 = vsub.s32 %v2041_v4, %v3716_v44 }
 0x455   : > { %1541 = vxpose.xlu0.b32.start.end [1/1] (short) (narrow) %v996_v31, 8 }
 0x459   : > { %1573 = vxpose.xlu0.b32.start.end [1/1] (short) (narrow) %v999_v32, 8 }
 0x45b   : > { %1509 = vxpose.xlu1.b32.start.end [1/1] (short) (narrow) %v993_v30, 8 }
 0x460   : > { %v1459_v33 = vpop.xlane.xlu1 %1458 }
 0x461   : > { %3015 = vrcp.f32 %v1459_v33 }
 0x46b   : > { %v3016_v34 = vpop.eup %3015 }
 0x46c   : > { %v1473_v35 = vmul.f32 %v3016_v34, %v3008_v13 }
 0x46e   : > { %2814 = vmatpush3.xpose.msk.msra.mxu0 %vm1129_vm2, %v1473_v35 }
 0x46f   : > { %2823 = vmatprep.subr.mxu0 %v3258_v1 }
 0x4ad   : > { %v1462_v36 = vpop.xlane.xlu0 %1461 }
 0x4ae   : > { %3017 = vrcp.f32 %v1462_v36 }
 0x4b1   : > { %v1465_v39 = vpop.xlane.xlu0 %1464 }
 0x4b2   : > { %3019 = vrcp.f32 %v1465_v39 }
 0x4b5   : > { %v1468_v40 = vpop.xlane.xlu1 %1467 }
 0x4b6   : > { %3021 = vrcp.f32 %v1468_v40 }
 0x4b8   : > { %v3018_v37 = vpop.eup %3017 }
 0x4b9   : > { %v1474_v38 = vmul.f32 %v3018_v37, %v3010_v24  ;;  %v2194_v24 = vld [vmem:[#allocation8 + $0x10] sm:$0xff] }
 0x4ba   : > { %v2896_v30 = vpack.c.bf16 %v2195_v25, %v2194_v24  ;;  %v2698_v25 = vld [vmem:[%s3960_s26] ss:$0 sm:$0xff]  ;;  %s3173_s26 = scalar_lea.vmem %s3824_s18, 128 }
 0x4bb   : > { %2819 = vmatpush3.xpose.msk.msra.mxu1 %vm1129_vm2, %v1474_v38  ;;  %p3174_p6 = scmp.ne.s32.totalorder %s3824_s18, %s3173_s26  ;;  %p3181_p4 = scmp.lt.s32.totalorder %s3179_s24, %s3173_s26 }
 0x4bc   : > { %2828 = vmatprep.subr.mxu1 %v3258_v1  ;;  %v3020_v41 = vpop.eup %3019 }
 0x4bd   : > { %v1475_v42 = vmul.f32 %v3020_v41, %v3012_v26  ;;  %p3175_p8 = pnand %p3174_p6, %p3968_p10  ;;  %p3182_p13 = por %p3181_p4, %p3180_p11 }
 0x4bf   : > { %p3176_p9 = pneg %p3175_p8 }
 0x4c0   : > { %v3022_v46 = vpop.eup %3021 }
 0x4c1   : > { %v1476_v47 = vmul.f32 %v3022_v46, %v3014_v28  ;;  %p3183_p2 = pnand %p3182_p13, %p3176_p9 }
 0x4d1   : > { %v1493_v43 = vpop.trf.xlu0 }
 0x4d2   : > { %2816 = vmatmul.mubr.msk.f32.vlgmr.msra.gmra.mrb[4].mxu0 %vm1129_vm2, %v1493_v43 }
 0x4d3   : > { %2824 = vmatpush3.xpose.msk.msra.mxu0 %vm1129_vm2, %v1475_v42  ;;  %2825 = vmatprep.mubr.msk.f32.mxu0 %vm3257_vm0, %v3258_v1 }
 0x4d4   : > { %2892 = vmatprep.subr.bf16.mxu0 %v3256_v0 }
 0x4d5   : > { %v1557_v45 = vpop.trf.xlu0 }
 0x4d6   : > { %2826 = vmatmul.mubr.msk.f32.vlgmr.msra.gmra.mrb[6].mxu0 %vm1129_vm2, %v1557_v45 }
 0x4d7   : > { %2841 = vmatprep.mubr.msk.f32.mxu0 %vm3257_vm0, %v3258_v1  ;;  %2894 = vmatpush3.bf16.msra.mxu0 %v2893_v60 }
 0x4d8   : > { %2895 = vmatprep.subr.bf16.mxu0 %v3256_v0 }
 0x4d9   : > { %v1589_v49 = vpop.trf.xlu0 }
 0x4db   : > { %v1525_v48 = vpop.trf.xlu1  ;;  %2897 = vmatpush3.bf16.msra.mxu0 %v2896_v30  ;;  %v2399_v30 = vld [vmem:[%s3882_s15 + $0x38] sm:$0xff] }
 0x4dc   : > { %2821 = vmatmul.mubr.msk.f32.vlgmr.msra.gmra.mrb[10].mxu1 %vm1129_vm2, %v1525_v48  ;;  %2904 = vmatprep.subr.bf16.mxu0 %v3256_v0 }
 0x4dd   : > { %2829 = vmatpush3.xpose.msk.msra.mxu1 %vm1129_vm2, %v1476_v47  ;;  %2830 = vmatprep.mubr.msk.f32.mxu1 %vm3257_vm0, %v3258_v1 }
 0x4de   : > { %2898 = vmatprep.subr.bf16.mxu1 %v3256_v0 }
 0x4e0   : > { %2831 = vmatmul.mubr.msk.f32.vlgmr.msra.gmra.mrb[12].mxu1 %vm1129_vm2, %v1589_v49 }
 0x4e1   : > { %2852 = vmatprep.mubr.msk.f32.mxu1 %vm3257_vm0, %v3258_v1 }
 0x5a5   : > { %v1677_v50 = vpop.f32.mrb[4].mxu0 }
 0x5a6   : > { %v2817_v51 = vpop.f32.mrb[5].mxu0  ;;  %1909 = vxpose.xlu1.b32.start.end [1/1] (short) (narrow) %v1677_v50, 8 }
 0x5a9   : > { %v1829_v52 = vpop.f32.mrb[6].mxu0 }
 0x5aa   : > { %v2827_v53 = vpop.f32.mrb[7].mxu0  ;;  %1973 = vxpose.xlu1.b32.start.end [1/1] (short) (narrow) %v1829_v52, 8 }
 0x5af   : > { %v1753_v54 = vpop.f32.mrb[10].mxu1 }
 0x5b0   : > { %1941 = vxpose.xlu0.b32.start.end [1/1] (short) (narrow) %v1753_v54, 8  ;;  %v2822_v55 = vpop.f32.mrb[11].mxu1 }
 0x5b3   : > { %v1905_v56 = vpop.f32.mrb[12].mxu1 }
 0x5b4   : > { %2005 = vxpose.xlu0.b32.start.end [1/1] (short) (narrow) %v1905_v56, 8  ;;  %v2832_v57 = vpop.f32.mrb[13].mxu1 }
 0x626   : > { %v1925_v61 = vpop.trf.xlu1 }
 0x62a   : > { %v1989_v6 = vpop.trf.xlu1 }
 0x62b   : > { %v2037_v9 = vcombine.low %v1925_v61, %v1989_v6  ;;  %v2038_v11 = vcombine.high %v1925_v61, %v1989_v6 }
 0x62d   : > { %v2045_v16 = vrot.slane %v2037_v9, %v2044_v8  ;;  %v2052_v17 = vrot.slane %v2038_v11, %v2044_v8  ;;  %v2309_v9 = vld [vmem:[#allocation10 + $0x10] sm:$0xff]  ;;  %v2310_v11 = vld [vmem:[#allocation10 + $0x18] sm:$0xff] }
 0x630   : > { %v1957_v5 = vpop.trf.xlu0 }
 0x634   : > { %v2021_v12 = vpop.trf.xlu0 }
 0x635   : > { %v2053_v13 = vcombine.low %v1957_v5, %v2021_v12  ;;  %v2054_v14 = vcombine.high %v1957_v5, %v2021_v12  ;;  %v2902_v12 = vpack.c.bf16 %v2310_v11, %v2309_v9 }
 0x637   : > { %v2061_v18 = vrot.slane %v2053_v13, %v2044_v8  ;;  %v2068_v19 = vrot.slane %v2054_v14, %v2044_v8  ;;  %v2393_v13 = vld [vmem:[%s3882_s15 + $0x8] sm:$0xff]  ;;  %v2394_v14 = vld [vmem:[%s3882_s15 + $0x10] sm:$0xff] }
 0x639   : > { %v2069_v20 = vcombine.low %v2045_v16, %v2061_v18  ;;  %v2070_v21 = vcombine.high %v2045_v16, %v2061_v18  ;;  %v2085_v22 = vcombine.low %v2052_v17, %v2068_v19  ;;  %v2086_v23 = vcombine.high %v2052_v17, %v2068_v19  ;;  %v2395_v16 = vld [vmem:[%s3882_s15 + $0x18] sm:$0xff]  ;;  %v2396_v18 = vld [vmem:[%s3882_s15 + $0x20] sm:$0xff]  ;;  %v2397_v19 = vld [vmem:[%s3882_s15 + $0x28] sm:$0xff] }
 0x63a   : > { %v2908_v17 = vpack.c.bf16 %v2395_v16, %v2394_v14 }
 0x63b   : > { %v2077_v26 = vrot.slane %v2069_v20, %v2076_v15  ;;  %v2084_v27 = vrot.slane %v2070_v21, %v2076_v15  ;;  %v2093_v28 = vrot.slane %v2085_v22, %v2076_v15  ;;  %v2100_v29 = vrot.slane %v2086_v23, %v2076_v15 }
 0x63c   : > { %v2911_v20 = vpack.c.bf16 %v2397_v19, %v2396_v18 }
 0x63d   : > { %v2105_v31 = vcombine.low %v2077_v26, %v2084_v27  ;;  %v2694_v32 = vcombine.high %v2077_v26, %v2084_v27  ;;  %v2121_v33 = vcombine.low %v2093_v28, %v2100_v29  ;;  %v2695_v34 = vcombine.high %v2093_v28, %v2100_v29  ;;  %v2699_v27 = vld [vmem:[%s3961_s2] ss:$0 sm:$0xff] }
 0x63f   : > { %v2112_v35 = vrot.slane %v2105_v31, %v2044_v8  ;;  %v2120_v36 = vrot.slane %v2694_v32, %v2044_v8  ;;  %v2128_v37 = vrot.slane %v2121_v33, %v2044_v8  ;;  %v2136_v38 = vrot.slane %v2695_v34, %v2044_v8  ;;  %v2700_v32 = vld [vmem:[%s3962_s16] ss:$0 sm:$0xff] }
 0x641   : > { %v2138_v39 = vcombine.high %v2112_v35, %v2120_v36  ;;  %v2154_v40 = vcombine.high %v2128_v37, %v2136_v38  ;;  %v2137_v41 = vcombine.low %v2112_v35, %v2120_v36  ;;  %v2153_v42 = vcombine.low %v2128_v37, %v2136_v38 }
 0x643   : > { %v2152_v43 = vrot.slane %v2138_v39, %v2076_v15  ;;  %v2168_v45 = vrot.slane %v2154_v40, %v2076_v15  ;;  %v2145_v46 = vrot.slane %v2137_v41, %v2076_v15  ;;  %v2161_v47 = vrot.slane %v2153_v42, %v2076_v15 }
 0x645   : > { %v2171_v48 = vcombine.low %v2152_v43, %v2168_v45  ;;  %v2170_v49 = vcombine.high %v2145_v46, %v2161_v47  ;;  %v2169_v50 = vcombine.low %v2145_v46, %v2161_v47  ;;  %v2172_v51 = vcombine.high %v2152_v43, %v2168_v45 }
 0x647   : > { %2178 = vrot.lane.b32.xlu0 %v2171_v48, %s3265_s27  ;;  %2174 = vrot.lane.b32.xlu1 %v2170_v49, %s3266_s22  ;;  %s3967_s27 = sld [smem:[#allocation33_spill]] }
 0x64b   : > { %2182 = vrot.lane.b32.xlu1 %v2172_v51, %s3267_s3  ;;  %s3963_s3 = sld [smem:[#allocation30_spill]] }
 0x64d   : > { %s3822_s22 = scalar_lea.hbm %s3967_s27, %s2707_s28 }
 0x651   : > { %v2702_v37 = vld [vmem:[%s3963_s3] ss:$0 sm:$0xff]  ;;  %s2513_s3 = scalar_lea.sflag [#allocation4], %s3602_s21 }
 0x6b9   : > { %v2175_v52 = vpop.permute.xlu1 %2174  ;;  %v2179_v53 = vpop.permute.xlu0 %2178 }
 0x6ba   : > { %v2185_v54 = vsel %vm1129_vm2, %v2169_v50, %v2175_v52 }
 0x6bb   : > { %v2187_v56 = vsel %vm2186_vm4, %v2185_v54, %v2179_v53  ;;  %v2704_v53 = vld [vmem:[%s3965_s23] ss:$0 sm:$0xff] }
 0x6bd   : > { %v2183_v55 = vpop.permute.xlu1 %2182 }
 0x6be   : > { %v2189_v57 = vsel %vm2188_vm5, %v2187_v56, %v2183_v55  ;;  %v2705_v55 = vld [vmem:[%s3966_s0] ss:$0 sm:$0xff] }
 0x6bf   : > { %v2191_v58 = vsel %vm2190_vm6, 0.0, %v2189_v57 }
 0x6c0   : > { %2842 = vmatmul.mubr.msk.f32.vlgmr.msra.gmra.mrb[8].mxu0 %vm732_vm1, %v2191_v58 }
 0x6c1   : > { %2871 = vmatprep.mubr.msk.f32.mxu0 %vm3257_vm0, %v3258_v1  ;;  %v2307_v1 = vld [vmem:[#allocation10] sm:$0xff] }
 0x6c2   : > { %v2899_v8 = vpack.c.bf16 %v2308_v7, %v2307_v1 }
 0x6c4   : > { %2900 = vmatpush3.bf16.msra.mxu1 %v2899_v8 }
 0x6c5   : > { %2901 = vmatprep.subr.bf16.mxu1 %v3256_v0 }
 0x6c8   : > { %2903 = vmatpush3.bf16.msra.mxu1 %v2902_v12 }
 0x793   : > { %v2272_v60 = vpop.f32.mrb[8].mxu0 }
 0x794   : > { %v2273_v61 = vadd.f32 %v2696_v59, %v2272_v60  ;;  %v2843_v62 = vpop.f32.mrb[9].mxu0 }
 0x796   : > { %v2276_v63 = vadd.f32 %v2273_v61, %v3649_v10  ;;  %v2392_v10 = vld [vmem:[%s3882_s15] sm:$0xff] }
 0x797   : > { %v2905_v15 = vpack.c.bf16 %v2393_v13, %v2392_v10 }
 0x798   : > { %v2279_v44 = vsel %vm732_vm1, %v2276_v63, 0.0 }
 0x799   : > { %2280 = vadd.xlane.f32.xlu1 %v2279_v44  ;;  %2906 = vmatpush3.bf16.msra.mxu0 %v2905_v15 }
 0x79a   : > { %2907 = vmatprep.subr.bf16.mxu0 %v3256_v0 }
 0x79d   : > { %2909 = vmatpush3.bf16.msra.mxu0 %v2908_v17 }
 0x79e   : > { %2910 = vmatprep.subr.bf16.mxu0 %v3256_v0 }
 0x7a1   : > { %2912 = vmatpush3.bf16.msra.mxu0 %v2911_v20 }
 0x7a2   : > { %2913 = vmatprep.subr.bf16.mxu0 %v3256_v0  ;;  %v2398_v0 = vld [vmem:[%s3882_s15 + $0x30] sm:$0xff] }
 0x7a3   : > { %v2914_v31 = vpack.c.bf16 %v2399_v30, %v2398_v0 }
 0x7a5   : > { %2915 = vmatpush3.bf16.msra.mxu0 %v2914_v31 }
 0x826   : > { %v2281_v2 = vpop.xlane.xlu1 %2280 }
 0x827   : > { %v2283_v3 = vmul.f32 0.03125, %v2281_v2 }
 0x829   : > { %v2284_v4 = vsub.f32 %v2276_v63, %v2283_v3 }
 0x82b   : > { %v2285_v5 = vmul.f32 %v2284_v4, %v2284_v4 }
 0x82d   : > { %v2286_v6 = vsel %vm732_vm1, %v2285_v5, 0.0 }
 0x82e   : > { %2287 = vadd.xlane.f32.xlu0 %v2286_v6 }
 0x8bb   : > { %v2288_v21 = vpop.xlane.xlu0 %2287 }
 0x8bc   : > { %v2289_v22 = vmul.f32 0.03125, %v2288_v21 }
 0x8be   : > { %v2290_v23 = vadd.f32 1e-05, %v2289_v22 }
 0x8c0   : > { %3023 = vrsqrt.f32 %v2290_v23 }
 0x8ca   : > { %v3024_v24 = vpop.eup %3023 }
 0x8cb   : > { %v2292_v26 = vmul.f32 %v3024_v24, %v2284_v4 }
 0x8cd   : > { %v2299_v28 = vmul.f32 %v2698_v25, %v2292_v26 }
 0x8cf   : > { %v2306_v29 = vadd.f32 %v2699_v27, %v2299_v28 }
 0x8d1   : > { %2853 = vmatmul.mubr.msk.f32.vlgmr.msra.gmra.mrb[14].mxu1 %vm732_vm1, %v2306_v29 }
 0x9a4   : > { %v2387_v33 = vpop.f32.mrb[14].mxu1 }
 0x9a5   : > { %v2388_v34 = vadd.f32 %v2700_v32, %v2387_v33  ;;  %v2854_v35 = vpop.f32.mrb[15].mxu1 }
 0x9a7   : > { %v2391_v36 = vmax.f32 %v2388_v34, 0.0 }
 0x9a9   : > { %2872 = vmatmul.mubr.msk.f32.vlgmr.msra.gmra.mrb[10].mxu0 %vm2407_vm7, %v2391_v36 }
 0xa7c   : > { %v2477_v38 = vpop.f32.mrb[10].mxu0 }
 0xa7d   : > { %v2478_v39 = vadd.f32 %v2702_v37, %v2477_v38  ;;  %v2873_v40 = vpop.f32.mrb[11].mxu0 }
 0xa7f   : > { %v2481_v41 = vadd.f32 %v2478_v39, %v2306_v29 }
 0xa81   : > { %v2484_v42 = vsel %vm732_vm1, %v2481_v41, 0.0 }
 0xa82   : > { %2485 = vadd.xlane.f32.xlu1 %v2484_v42 }
 0xb0f   : > { %v2486_v43 = vpop.xlane.xlu1 %2485 }
 0xb10   : > { %v2487_v45 = vmul.f32 0.03125, %v2486_v43 }
 0xb12   : > { %v2488_v46 = vsub.f32 %v2481_v41, %v2487_v45 }
 0xb14   : > { %v2489_v47 = vmul.f32 %v2488_v46, %v2488_v46 }
 0xb16   : > { %v2490_v48 = vsel %vm732_vm1, %v2489_v47, 0.0 }
 0xb17   : > { %2491 = vadd.xlane.f32.xlu0 %v2490_v48 }
 0xba4   : > { %v2492_v49 = vpop.xlane.xlu0 %2491 }
 0xba5   : > { %v2493_v50 = vmul.f32 0.03125, %v2492_v49 }
 0xba7   : > { %v2494_v51 = vadd.f32 1e-05, %v2493_v50 }
 0xba9   : > { %3025 = vrsqrt.f32 %v2494_v51 }
 0xbb3   : > { %v3026_v52 = vpop.eup %3025 }
 0xbb4   : > { %v2496_v54 = vmul.f32 %v3026_v52, %v2488_v46 }
 0xbb6   : > { %v2503_v56 = vmul.f32 %v2704_v53, %v2496_v54 }
 0xbb8   : > { %v2510_v57 = vadd.f32 %v2705_v55, %v2503_v56 }
 0xbba   : > { %2511 = vst.msk [vmem:[%s717_s14] sm:$0xff] %vm732_vm1, %v2510_v57 }
 0xbbb   : > { %3186 = shalt.err (!%p3183_p2)
}
 0xbbc   : > { %s3187_s21 = scalar_lea.hbm %s3822_s22, 128  ;;  %s3191_s29 = scalar_lea.hbm %s3967_s27, 256 }
 0xbbd   : > { %p3188_p5 = scmp.ne.s32.totalorder %s3822_s22, %s3187_s21  ;;  %p3192_p0 = scmp.lt.u32.totalorder %s3822_s22, %s3967_s27 }
 0xbbe   : > { %p3193_p7 = scmp.lt.u32.totalorder %s3191_s29, %s3187_s21  ;;  %p3195_p6 = scmp.lt.u32.totalorder %s3187_s21, %s3822_s22 }
 0xbbf   : > { %p3189_p12 = pnand %p3188_p5, %p3968_p10 }
 0xbc0   : > { %p3194_p1 = por %p3193_p7, %p3192_p0 }
 0xbc1   : > { %p3190_p3 = pneg %p3189_p12 }
 0xbc2   : > { %p3196_p8 = por %p3195_p6, %p3194_p1 }
 0xbc4   : > { %p3197_p9 = pnand %p3196_p8, %p3190_p3 }
 0xbc6   : > { %3200 = shalt.err (!%p3197_p9)
}
 0xbc7   : > { %2930 = dma.vmem_to_hbm [thread:$0]  (%p3968_p10), %s3824_s18, 128, %s3822_s22, %s2513_s3  }
 0xbc8 PF: > { %s3969_s14 = sld [smem:[#allocation16_spill]]  ;;  %s3970_s25 = sld [smem:[#allocation18_spill]] }
 0xbc9   : > { %s3971_s16 = sld [smem:[#allocation17_spill]] }
 0xbce   : > { %s2538_s26 = sand.u32 1, %s3969_s14   ;;  %p3972_p11 = scmp.ne.s32.totalorder %s3970_s25, 0 }
 0xbcf   : > { %p3973_p4 = scmp.ge.s32.totalorder %s3971_s16, 2  ;;  %s2539_s1 = scalar_lea.sflag [#allocation4], %s2538_s26 }
 0xbd1   : > { %p2950_p13 = pnand %p3973_p4, %p3972_p11 }
 0xbd3   : > { %3230 = dma.done.wait (!%p2950_p13), %s2539_s1, 128  }
 0xbd4   : > { %3232 = vsyncadd (!%p2950_p13), %s2539_s1, 4294967168  ;;  %s3974_s21 = sld [smem:[#allocation19_spill]]  ;;  %s3975_s6 = sld [smem:[#allocation20_spill]] }
 0xbd5   : > { %s3976_s0 = smov %s3239_s30  ;;  %s3977_s30 = smov %s3243_s20 }
 0xbda   : > { %p36_p2 = scmp.ge.s32.totalorder %s3974_s21, 4   ;;  %s3978_s20 = smov %s3975_s6 }
 0xbdc   :  { %38 = sbr.rel (!%p36_p2) target bundleno = 21 (0x15), region = 173 }
 0xbe3   :  { %2544 = vsyncpa [#allocation3], 1 }
 0xbe4   :  { %2546 = vsyncpa [#allocation3 + $0x1], 1 }
 0xbe5   :  { %2547 = vsyncpa [#allocation6], 1 }
 0xbe6   :  { %2549 = vsyncpa [#allocation6 + $0x1], 1 }
 0xbe7   :  { %2550 = vsyncpa [#allocation9], 1 }
 0xbe8   :  { %2551 = vsyncpa [#allocation4], 1 }
 0xbe9   :  { %2553 = vsyncpa [#allocation4 + $0x1], 1 }

</bundles_post_ra>
